<compile_context>
chip_gen: v6e
topology: v6e:2x2x1
jax: 0.10.0
libtpu: 0.0.40
codegen_flags: <defaults>
</compile_context>

<pallas_src>
import jax
import jax.numpy as jnp
from jax import lax
from jax.experimental import pallas as pl
from jax.experimental.pallas import tpu as pltpu

S, B, D, H = 8, 2, 32, 32          # seq_len, batch, input_size, hidden_size
LN_EPS = 1e-5


def _bi_gru_kernel(x_ref, valid_ref, gamma_ref, beta_ref,
                   wih_f_ref, wih_b_ref, whh_f_ref, whh_b_ref, out_ref):
    # x_ref: (S*B, D) time-major rows (row t*B+b == time t, batch b), f32
    x = x_ref[...]

    # ---- LayerNorm over the feature axis (two-pass variance) ----
    mean = jnp.mean(x, axis=-1, keepdims=True)
    xc = x - mean
    var = jnp.mean(xc * xc, axis=-1, keepdims=True)
    xn = xc * lax.rsqrt(var + LN_EPS)
    xn = xn * gamma_ref[...] + beta_ref[...]                    # (S*B, D)
    # dropout: identity in eval mode

    # ---- input projections, bf16 operands / f32 accumulate (off the chain) ----
    xn16 = xn.astype(jnp.bfloat16)
    gx_f = jnp.dot(xn16, wih_f_ref[...], preferred_element_type=jnp.float32)  # (S*B, 3H)
    gx_b = jnp.dot(xn16, wih_b_ref[...], preferred_element_type=jnp.float32)  # (S*B, 3H)

    # ---- hoisted per-step gate inputs and validity masks (not on the chain) ----
    # g_steps[t]: rows 0..B-1 = forward gates @ time t, rows B..2B-1 = backward
    # gates @ original time S-1-t.
    g_steps = [
        jnp.concatenate(
            [gx_f[t * B:(t + 1) * B, :], gx_b[(S - 1 - t) * B:(S - t) * B, :]],
            axis=0)
        for t in range(S)]
    valid_f = valid_ref[...]                                    # (S*2B, H) f32
    v_steps = [valid_f[t * 2 * B:(t + 1) * 2 * B, :] > 0.5 for t in range(S)]

    whh_f = whh_f_ref[...]                                      # (H, 3H) bf16
    whh_b = whh_b_ref[...]                                      # (H, 3H) bf16

    # row selector (fwd rows True), pre-broadcast once to gate width
    sel3 = lax.broadcasted_iota(jnp.int32, (2 * B, 3 * H), 0) < B

    # ---- fused bidirectional recurrence, fully unrolled (S = 8, static) ----
    # rows 0..B-1 of h carry the forward state at time t;
    # rows B..2B-1 carry the backward state at original time S-1-t.
    fwd_outs = [None] * S
    bwd_outs = [None] * S
    h = jnp.zeros((2 * B, H), jnp.float32)
    for t in range(S):
        h16 = h.astype(jnp.bfloat16)
        gh_f = jnp.dot(h16, whh_f, preferred_element_type=jnp.float32)   # (2B, 3H)
        gh_b = jnp.dot(h16, whh_b, preferred_element_type=jnp.float32)   # (2B, 3H)
        gh = jnp.where(sel3, gh_f, gh_b)                                 # direction select

        g = g_steps[t]                                                   # (2B, 3H)
        # PyTorch GRU: r, z, n gate order; biases are zero by construction.
        rz = jax.nn.sigmoid(g[:, 0:2 * H] + gh[:, 0:2 * H])
        r = rz[:, 0:H]
        z = rz[:, H:2 * H]
        n = jnp.tanh(g[:, 2 * H:3 * H] + r * gh[:, 2 * H:3 * H])
        h_new = n + z * (h - n)                       # == (1-z)*n + z*h

        vb = v_steps[t]                               # (2B, H) bool, pre-broadcast
        h_out = jnp.where(vb, h_new, 0.0)             # zero output when padded
        h = jnp.where(vb, h_new, h)                   # freeze state past length

        fwd_outs[t] = h_out[0:B]                      # forward half, time t
        bwd_outs[S - 1 - t] = h_out[B:2 * B]          # backward half, time S-1-t

    # ---- single full-slab store: (S*B, 2H) assembled once after the loop ----
    rows = [jnp.concatenate([fwd_outs[t], bwd_outs[t]], axis=1) for t in range(S)]
    out_ref[...] = jnp.concatenate(rows, axis=0)      # (S*B, 2H)


def bi_gru_layer(vec, mask, params):
    """vec: (S,B,D) f32, mask: (B,S) f32 -> (S,B,2H) f32."""
    gamma, beta, wih_f, whh_f, wih_b, whh_b = params

    x2 = vec.reshape(S * B, D)                        # reshape done in wrapper

    # pre-broadcast validity to (S*2B, H) in fused-step row order:
    # rows t*2B..t*2B+B-1 -> mask[:, t] (fwd), rows +B.. -> mask[:, S-1-t] (bwd)
    m = mask.astype(jnp.float32).T                    # (S, B)
    v2 = jnp.concatenate([m, m[::-1]], axis=1)        # (S, 2B)
    valid = jnp.broadcast_to(v2[:, :, None], (S, 2 * B, H)).reshape(S * 2 * B, H)

    bf = jnp.bfloat16
    out2 = pl.pallas_call(
        _bi_gru_kernel,
        out_shape=jax.ShapeDtypeStruct((S * B, 2 * H), jnp.float32),
        in_specs=[pl.BlockSpec(memory_space=pltpu.MemorySpace.VMEM)] * 8,
        out_specs=pl.BlockSpec(memory_space=pltpu.MemorySpace.VMEM),
    )(x2, valid, gamma, beta,
      wih_f.astype(bf), wih_b.astype(bf), whh_f.astype(bf), whh_b.astype(bf))
    return out2.reshape(S, B, 2 * H)


bi_gru_layer_jit = jax.jit(bi_gru_layer)


def init_params(key):
    """Deterministic init matching reset_parameters: xavier_uniform for W_ih,
    orthogonal for W_hh, zero biases (folded out), LayerNorm gamma=1 / beta=0."""
    k1, k2, k3, k4 = jax.random.split(key, 4)

    def xavier_ih(k):
        # torch weight_ih_l0 shape (3H, D): fan_in=D, fan_out=3H
        a = (6.0 / (D + 3 * H)) ** 0.5
        w = jax.random.uniform(k, (3 * H, D), jnp.float32, -a, a)
        return w.T                                    # (D, 3H) for x @ W

    def orth_hh(k):
        w = jax.nn.initializers.orthogonal()(k, (3 * H, H), jnp.float32)
        return w.T                                    # (H, 3H) for h @ W

    gamma = jnp.ones((1, D), jnp.float32)
    beta = jnp.zeros((1, D), jnp.float32)
    # biases are constant-initialized to 0 -> folded out of the kernel
    return (gamma, beta, xavier_ih(k1), orth_hh(k2), xavier_ih(k3), orth_hh(k4))


if __name__ == "__main__":
    key = jax.random.PRNGKey(0)
    kx, kp = jax.random.split(key)

    vec = jax.random.normal(kx, (S, B, D), jnp.float32)
    # left-aligned mask; at least one full-length sequence so the padded output
    # has the same seq_len as the input (matching pad_packed_sequence here).
    lens = jnp.array([S, 5], jnp.int32)
    mask = (jnp.arange(S)[None, :] < lens[:, None]).astype(jnp.float32)   # (B, S)

    params = init_params(kp)
    out = bi_gru_layer_jit(vec, mask, params)
    out = jax.block_until_ready(out)
    assert out.shape == (S, B, 2 * H) and out.dtype == jnp.float32
    assert bool(jnp.all(jnp.isfinite(out)))
    print("KERNEL_OK")
</pallas_src>

<mosaic_0001>
module attributes {stable_mosaic.version = 11 : i64} {
  func.func @_bi_gru_kernel(%arg0: memref<16x32xf32, #tpu.memory_space<vmem>>, %arg1: memref<32x32xf32, #tpu.memory_space<vmem>>, %arg2: memref<1x32xf32, #tpu.memory_space<vmem>>, %arg3: memref<1x32xf32, #tpu.memory_space<vmem>>, %arg4: memref<32x96xbf16, #tpu.memory_space<vmem>>, %arg5: memref<32x96xbf16, #tpu.memory_space<vmem>>, %arg6: memref<32x96xbf16, #tpu.memory_space<vmem>>, %arg7: memref<32x96xbf16, #tpu.memory_space<vmem>>, %arg8: memref<16x64xf32, #tpu.memory_space<vmem>>) attributes {dimension_semantics = [], scalar_prefetch = 0 : i64, scratch_operands = 0 : i64, tpu.core_type = #tpu.core_type<tc>} {
    %c0 = arith.constant 0 : index
    %c0_0 = arith.constant 0 : index
    %0 = vector.load %arg0[%c0, %c0_0] : memref<16x32xf32, #tpu.memory_space<vmem>>, vector<16x32xf32>
    %cst = arith.constant dense<0.000000e+00> : vector<16xf32>
    %1 = vector.multi_reduction <add>, %0, %cst [1] : vector<16x32xf32> to vector<16xf32>
    %2 = vector.shape_cast %1 : vector<16xf32> to vector<16x1xf32>
    %cst_1 = arith.constant 3.200000e+01 : f32
    %3 = vector.broadcast %cst_1 : f32 to vector<16x1xf32>
    %4 = arith.divf %2, %3 : vector<16x1xf32>
    %5 = vector.broadcast %4 : vector<16x1xf32> to vector<16x32xf32>
    %6 = arith.subf %0, %5 : vector<16x32xf32>
    %7 = arith.mulf %6, %6 : vector<16x32xf32>
    %cst_2 = arith.constant dense<0.000000e+00> : vector<16xf32>
    %8 = vector.multi_reduction <add>, %7, %cst_2 [1] : vector<16x32xf32> to vector<16xf32>
    %9 = vector.shape_cast %8 : vector<16xf32> to vector<16x1xf32>
    %cst_3 = arith.constant 3.200000e+01 : f32
    %10 = vector.broadcast %cst_3 : f32 to vector<16x1xf32>
    %11 = arith.divf %9, %10 : vector<16x1xf32>
    %cst_4 = arith.constant 9.99999974E-6 : f32
    %12 = vector.broadcast %cst_4 : f32 to vector<16x1xf32>
    %13 = arith.addf %11, %12 : vector<16x1xf32>
    %14 = math.rsqrt %13 : vector<16x1xf32>
    %15 = vector.broadcast %14 : vector<16x1xf32> to vector<16x32xf32>
    %16 = arith.mulf %6, %15 : vector<16x32xf32>
    %c0_5 = arith.constant 0 : index
    %c0_6 = arith.constant 0 : index
    %17 = vector.load %arg2[%c0_5, %c0_6] : memref<1x32xf32, #tpu.memory_space<vmem>>, vector<1x32xf32>
    %18 = vector.broadcast %17 : vector<1x32xf32> to vector<16x32xf32>
    %19 = arith.mulf %16, %18 : vector<16x32xf32>
    %c0_7 = arith.constant 0 : index
    %c0_8 = arith.constant 0 : index
    %20 = vector.load %arg3[%c0_7, %c0_8] : memref<1x32xf32, #tpu.memory_space<vmem>>, vector<1x32xf32>
    %21 = vector.broadcast %20 : vector<1x32xf32> to vector<16x32xf32>
    %22 = arith.addf %19, %21 : vector<16x32xf32>
    %23 = arith.truncf %22 : vector<16x32xf32> to vector<16x32xbf16>
    %c0_9 = arith.constant 0 : index
    %c0_10 = arith.constant 0 : index
    %24 = vector.load %arg4[%c0_9, %c0_10] : memref<32x96xbf16, #tpu.memory_space<vmem>>, vector<32x96xbf16>
    %cst_11 = arith.constant dense<0.000000e+00> : vector<16x96xf32>
    %25 = tpu.matmul %23, %24, %cst_11 {dimension_numbers = #tpu.dot_dimension_numbers<[1], [0], [0], [1], [0, 0, 1, 1], [], []>} : vector<16x32xbf16>, vector<32x96xbf16>, vector<16x96xf32> -> vector<16x96xf32>
    %c0_12 = arith.constant 0 : index
    %c0_13 = arith.constant 0 : index
    %26 = vector.load %arg5[%c0_12, %c0_13] : memref<32x96xbf16, #tpu.memory_space<vmem>>, vector<32x96xbf16>
    %cst_14 = arith.constant dense<0.000000e+00> : vector<16x96xf32>
    %27 = tpu.matmul %23, %26, %cst_14 {dimension_numbers = #tpu.dot_dimension_numbers<[1], [0], [0], [1], [0, 0, 1, 1], [], []>} : vector<16x32xbf16>, vector<32x96xbf16>, vector<16x96xf32> -> vector<16x96xf32>
    %28 = vector.extract_strided_slice %25 {offsets = [0, 0], sizes = [2, 96], strides = [1, 1]} : vector<16x96xf32> to vector<2x96xf32>
    %29 = vector.extract_strided_slice %27 {offsets = [14, 0], sizes = [2, 96], strides = [1, 1]} : vector<16x96xf32> to vector<2x96xf32>
    %30 = tpu.concatenate %28, %29 in 0 : vector<2x96xf32>, vector<2x96xf32> -> vector<4x96xf32>
    %31 = vector.extract_strided_slice %25 {offsets = [2, 0], sizes = [2, 96], strides = [1, 1]} : vector<16x96xf32> to vector<2x96xf32>
    %32 = vector.extract_strided_slice %27 {offsets = [12, 0], sizes = [2, 96], strides = [1, 1]} : vector<16x96xf32> to vector<2x96xf32>
    %33 = tpu.concatenate %31, %32 in 0 : vector<2x96xf32>, vector<2x96xf32> -> vector<4x96xf32>
    %34 = vector.extract_strided_slice %25 {offsets = [4, 0], sizes = [2, 96], strides = [1, 1]} : vector<16x96xf32> to vector<2x96xf32>
    %35 = vector.extract_strided_slice %27 {offsets = [10, 0], sizes = [2, 96], strides = [1, 1]} : vector<16x96xf32> to vector<2x96xf32>
    %36 = tpu.concatenate %34, %35 in 0 : vector<2x96xf32>, vector<2x96xf32> -> vector<4x96xf32>
    %37 = vector.extract_strided_slice %25 {offsets = [6, 0], sizes = [2, 96], strides = [1, 1]} : vector<16x96xf32> to vector<2x96xf32>
    %38 = vector.extract_strided_slice %27 {offsets = [8, 0], sizes = [2, 96], strides = [1, 1]} : vector<16x96xf32> to vector<2x96xf32>
    %39 = tpu.concatenate %37, %38 in 0 : vector<2x96xf32>, vector<2x96xf32> -> vector<4x96xf32>
    %40 = vector.extract_strided_slice %25 {offsets = [8, 0], sizes = [2, 96], strides = [1, 1]} : vector<16x96xf32> to vector<2x96xf32>
    %41 = vector.extract_strided_slice %27 {offsets = [6, 0], sizes = [2, 96], strides = [1, 1]} : vector<16x96xf32> to vector<2x96xf32>
    %42 = tpu.concatenate %40, %41 in 0 : vector<2x96xf32>, vector<2x96xf32> -> vector<4x96xf32>
    %43 = vector.extract_strided_slice %25 {offsets = [10, 0], sizes = [2, 96], strides = [1, 1]} : vector<16x96xf32> to vector<2x96xf32>
    %44 = vector.extract_strided_slice %27 {offsets = [4, 0], sizes = [2, 96], strides = [1, 1]} : vector<16x96xf32> to vector<2x96xf32>
    %45 = tpu.concatenate %43, %44 in 0 : vector<2x96xf32>, vector<2x96xf32> -> vector<4x96xf32>
    %46 = vector.extract_strided_slice %25 {offsets = [12, 0], sizes = [2, 96], strides = [1, 1]} : vector<16x96xf32> to vector<2x96xf32>
    %47 = vector.extract_strided_slice %27 {offsets = [2, 0], sizes = [2, 96], strides = [1, 1]} : vector<16x96xf32> to vector<2x96xf32>
    %48 = tpu.concatenate %46, %47 in 0 : vector<2x96xf32>, vector<2x96xf32> -> vector<4x96xf32>
    %49 = vector.extract_strided_slice %25 {offsets = [14, 0], sizes = [2, 96], strides = [1, 1]} : vector<16x96xf32> to vector<2x96xf32>
    %50 = vector.extract_strided_slice %27 {offsets = [0, 0], sizes = [2, 96], strides = [1, 1]} : vector<16x96xf32> to vector<2x96xf32>
    %51 = tpu.concatenate %49, %50 in 0 : vector<2x96xf32>, vector<2x96xf32> -> vector<4x96xf32>
    %c0_15 = arith.constant 0 : index
    %c0_16 = arith.constant 0 : index
    %52 = vector.load %arg1[%c0_15, %c0_16] : memref<32x32xf32, #tpu.memory_space<vmem>>, vector<32x32xf32>
    %53 = vector.extract_strided_slice %52 {offsets = [0, 0], sizes = [4, 32], strides = [1, 1]} : vector<32x32xf32> to vector<4x32xf32>
    %cst_17 = arith.constant 5.000000e-01 : f32
    %54 = vector.broadcast %cst_17 : f32 to vector<4x32xf32>
    %55 = arith.cmpf ogt, %53, %54 : vector<4x32xf32>
    %56 = vector.extract_strided_slice %52 {offsets = [4, 0], sizes = [4, 32], strides = [1, 1]} : vector<32x32xf32> to vector<4x32xf32>
    %cst_18 = arith.constant 5.000000e-01 : f32
    %57 = vector.broadcast %cst_18 : f32 to vector<4x32xf32>
    %58 = arith.cmpf ogt, %56, %57 : vector<4x32xf32>
    %59 = vector.extract_strided_slice %52 {offsets = [8, 0], sizes = [4, 32], strides = [1, 1]} : vector<32x32xf32> to vector<4x32xf32>
    %cst_19 = arith.constant 5.000000e-01 : f32
    %60 = vector.broadcast %cst_19 : f32 to vector<4x32xf32>
    %61 = arith.cmpf ogt, %59, %60 : vector<4x32xf32>
    %62 = vector.extract_strided_slice %52 {offsets = [12, 0], sizes = [4, 32], strides = [1, 1]} : vector<32x32xf32> to vector<4x32xf32>
    %cst_20 = arith.constant 5.000000e-01 : f32
    %63 = vector.broadcast %cst_20 : f32 to vector<4x32xf32>
    %64 = arith.cmpf ogt, %62, %63 : vector<4x32xf32>
    %65 = vector.extract_strided_slice %52 {offsets = [16, 0], sizes = [4, 32], strides = [1, 1]} : vector<32x32xf32> to vector<4x32xf32>
    %cst_21 = arith.constant 5.000000e-01 : f32
    %66 = vector.broadcast %cst_21 : f32 to vector<4x32xf32>
    %67 = arith.cmpf ogt, %65, %66 : vector<4x32xf32>
    %68 = vector.extract_strided_slice %52 {offsets = [20, 0], sizes = [4, 32], strides = [1, 1]} : vector<32x32xf32> to vector<4x32xf32>
    %cst_22 = arith.constant 5.000000e-01 : f32
    %69 = vector.broadcast %cst_22 : f32 to vector<4x32xf32>
    %70 = arith.cmpf ogt, %68, %69 : vector<4x32xf32>
    %71 = vector.extract_strided_slice %52 {offsets = [24, 0], sizes = [4, 32], strides = [1, 1]} : vector<32x32xf32> to vector<4x32xf32>
    %cst_23 = arith.constant 5.000000e-01 : f32
    %72 = vector.broadcast %cst_23 : f32 to vector<4x32xf32>
    %73 = arith.cmpf ogt, %71, %72 : vector<4x32xf32>
    %74 = vector.extract_strided_slice %52 {offsets = [28, 0], sizes = [4, 32], strides = [1, 1]} : vector<32x32xf32> to vector<4x32xf32>
    %cst_24 = arith.constant 5.000000e-01 : f32
    %75 = vector.broadcast %cst_24 : f32 to vector<4x32xf32>
    %76 = arith.cmpf ogt, %74, %75 : vector<4x32xf32>
    %c0_25 = arith.constant 0 : index
    %c0_26 = arith.constant 0 : index
    %77 = vector.load %arg6[%c0_25, %c0_26] : memref<32x96xbf16, #tpu.memory_space<vmem>>, vector<32x96xbf16>
    %c0_27 = arith.constant 0 : index
    %c0_28 = arith.constant 0 : index
    %78 = vector.load %arg7[%c0_27, %c0_28] : memref<32x96xbf16, #tpu.memory_space<vmem>>, vector<32x96xbf16>
    %79 = tpu.iota {dimensions = array<i32: 0>} : vector<4x96xi32>
    %c2_i32 = arith.constant 2 : i32
    %80 = vector.broadcast %c2_i32 : i32 to vector<4x96xi32>
    %81 = arith.cmpi slt, %79, %80 : vector<4x96xi32>
    %cst_29 = arith.constant 0.000000e+00 : f32
    %82 = vector.broadcast %cst_29 : f32 to vector<4x32xf32>
    %83 = arith.truncf %82 : vector<4x32xf32> to vector<4x32xbf16>
    %cst_30 = arith.constant dense<0.000000e+00> : vector<4x96xf32>
    %84 = tpu.matmul %83, %77, %cst_30 {dimension_numbers = #tpu.dot_dimension_numbers<[1], [0], [0], [1], [0, 0, 1, 1], [], []>} : vector<4x32xbf16>, vector<32x96xbf16>, vector<4x96xf32> -> vector<4x96xf32>
    %cst_31 = arith.constant dense<0.000000e+00> : vector<4x96xf32>
    %85 = tpu.matmul %83, %78, %cst_31 {dimension_numbers = #tpu.dot_dimension_numbers<[1], [0], [0], [1], [0, 0, 1, 1], [], []>} : vector<4x32xbf16>, vector<32x96xbf16>, vector<4x96xf32> -> vector<4x96xf32>
    %86 = arith.select %81, %84, %85 : vector<4x96xi1>, vector<4x96xf32>
    %87 = vector.extract_strided_slice %30 {offsets = [0, 0], sizes = [4, 64], strides = [1, 1]} : vector<4x96xf32> to vector<4x64xf32>
    %88 = vector.extract_strided_slice %86 {offsets = [0, 0], sizes = [4, 64], strides = [1, 1]} : vector<4x96xf32> to vector<4x64xf32>
    %89 = arith.addf %87, %88 : vector<4x64xf32>
    %90 = arith.negf %89 : vector<4x64xf32>
    %91 = math.exp %90 : vector<4x64xf32>
    %cst_32 = arith.constant 1.000000e+00 : f32
    %92 = vector.broadcast %cst_32 : f32 to vector<4x64xf32>
    %93 = arith.addf %92, %91 : vector<4x64xf32>
    %94 = arith.divf %92, %93 : vector<4x64xf32>
    %95 = vector.extract_strided_slice %94 {offsets = [0, 0], sizes = [4, 32], strides = [1, 1]} : vector<4x64xf32> to vector<4x32xf32>
    %96 = vector.extract_strided_slice %94 {offsets = [0, 32], sizes = [4, 32], strides = [1, 1]} : vector<4x64xf32> to vector<4x32xf32>
    %97 = vector.extract_strided_slice %30 {offsets = [0, 64], sizes = [4, 32], strides = [1, 1]} : vector<4x96xf32> to vector<4x32xf32>
    %98 = vector.extract_strided_slice %86 {offsets = [0, 64], sizes = [4, 32], strides = [1, 1]} : vector<4x96xf32> to vector<4x32xf32>
    %99 = arith.mulf %95, %98 : vector<4x32xf32>
    %100 = arith.addf %97, %99 : vector<4x32xf32>
    %101 = math.tanh %100 : vector<4x32xf32>
    %102 = arith.subf %82, %101 : vector<4x32xf32>
    %103 = arith.mulf %96, %102 : vector<4x32xf32>
    %104 = arith.addf %101, %103 : vector<4x32xf32>
    %cst_33 = arith.constant 0.000000e+00 : f32
    %105 = vector.broadcast %cst_33 : f32 to vector<4x32xf32>
    %106 = arith.select %55, %104, %105 : vector<4x32xi1>, vector<4x32xf32>
    %107 = arith.select %55, %104, %82 : vector<4x32xi1>, vector<4x32xf32>
    %108 = vector.extract_strided_slice %106 {offsets = [0, 0], sizes = [2, 32], strides = [1, 1]} : vector<4x32xf32> to vector<2x32xf32>
    %109 = vector.extract_strided_slice %106 {offsets = [2, 0], sizes = [2, 32], strides = [1, 1]} : vector<4x32xf32> to vector<2x32xf32>
    %110 = arith.truncf %107 : vector<4x32xf32> to vector<4x32xbf16>
    %cst_34 = arith.constant dense<0.000000e+00> : vector<4x96xf32>
    %111 = tpu.matmul %110, %77, %cst_34 {dimension_numbers = #tpu.dot_dimension_numbers<[1], [0], [0], [1], [0, 0, 1, 1], [], []>} : vector<4x32xbf16>, vector<32x96xbf16>, vector<4x96xf32> -> vector<4x96xf32>
    %cst_35 = arith.constant dense<0.000000e+00> : vector<4x96xf32>
    %112 = tpu.matmul %110, %78, %cst_35 {dimension_numbers = #tpu.dot_dimension_numbers<[1], [0], [0], [1], [0, 0, 1, 1], [], []>} : vector<4x32xbf16>, vector<32x96xbf16>, vector<4x96xf32> -> vector<4x96xf32>
    %113 = arith.select %81, %111, %112 : vector<4x96xi1>, vector<4x96xf32>
    %114 = vector.extract_strided_slice %33 {offsets = [0, 0], sizes = [4, 64], strides = [1, 1]} : vector<4x96xf32> to vector<4x64xf32>
    %115 = vector.extract_strided_slice %113 {offsets = [0, 0], sizes = [4, 64], strides = [1, 1]} : vector<4x96xf32> to vector<4x64xf32>
    %116 = arith.addf %114, %115 : vector<4x64xf32>
    %117 = arith.negf %116 : vector<4x64xf32>
    %118 = math.exp %117 : vector<4x64xf32>
    %cst_36 = arith.constant 1.000000e+00 : f32
    %119 = vector.broadcast %cst_36 : f32 to vector<4x64xf32>
    %120 = arith.addf %119, %118 : vector<4x64xf32>
    %121 = arith.divf %119, %120 : vector<4x64xf32>
    %122 = vector.extract_strided_slice %121 {offsets = [0, 0], sizes = [4, 32], strides = [1, 1]} : vector<4x64xf32> to vector<4x32xf32>
    %123 = vector.extract_strided_slice %121 {offsets = [0, 32], sizes = [4, 32], strides = [1, 1]} : vector<4x64xf32> to vector<4x32xf32>
    %124 = vector.extract_strided_slice %33 {offsets = [0, 64], sizes = [4, 32], strides = [1, 1]} : vector<4x96xf32> to vector<4x32xf32>
    %125 = vector.extract_strided_slice %113 {offsets = [0, 64], sizes = [4, 32], strides = [1, 1]} : vector<4x96xf32> to vector<4x32xf32>
    %126 = arith.mulf %122, %125 : vector<4x32xf32>
    %127 = arith.addf %124, %126 : vector<4x32xf32>
    %128 = math.tanh %127 : vector<4x32xf32>
    %129 = arith.subf %107, %128 : vector<4x32xf32>
    %130 = arith.mulf %123, %129 : vector<4x32xf32>
    %131 = arith.addf %128, %130 : vector<4x32xf32>
    %cst_37 = arith.constant 0.000000e+00 : f32
    %132 = vector.broadcast %cst_37 : f32 to vector<4x32xf32>
    %133 = arith.select %58, %131, %132 : vector<4x32xi1>, vector<4x32xf32>
    %134 = arith.select %58, %131, %107 : vector<4x32xi1>, vector<4x32xf32>
    %135 = vector.extract_strided_slice %133 {offsets = [0, 0], sizes = [2, 32], strides = [1, 1]} : vector<4x32xf32> to vector<2x32xf32>
    %136 = vector.extract_strided_slice %133 {offsets = [2, 0], sizes = [2, 32], strides = [1, 1]} : vector<4x32xf32> to vector<2x32xf32>
    %137 = arith.truncf %134 : vector<4x32xf32> to vector<4x32xbf16>
    %cst_38 = arith.constant dense<0.000000e+00> : vector<4x96xf32>
    %138 = tpu.matmul %137, %77, %cst_38 {dimension_numbers = #tpu.dot_dimension_numbers<[1], [0], [0], [1], [0, 0, 1, 1], [], []>} : vector<4x32xbf16>, vector<32x96xbf16>, vector<4x96xf32> -> vector<4x96xf32>
    %cst_39 = arith.constant dense<0.000000e+00> : vector<4x96xf32>
    %139 = tpu.matmul %137, %78, %cst_39 {dimension_numbers = #tpu.dot_dimension_numbers<[1], [0], [0], [1], [0, 0, 1, 1], [], []>} : vector<4x32xbf16>, vector<32x96xbf16>, vector<4x96xf32> -> vector<4x96xf32>
    %140 = arith.select %81, %138, %139 : vector<4x96xi1>, vector<4x96xf32>
    %141 = vector.extract_strided_slice %36 {offsets = [0, 0], sizes = [4, 64], strides = [1, 1]} : vector<4x96xf32> to vector<4x64xf32>
    %142 = vector.extract_strided_slice %140 {offsets = [0, 0], sizes = [4, 64], strides = [1, 1]} : vector<4x96xf32> to vector<4x64xf32>
    %143 = arith.addf %141, %142 : vector<4x64xf32>
    %144 = arith.negf %143 : vector<4x64xf32>
    %145 = math.exp %144 : vector<4x64xf32>
    %cst_40 = arith.constant 1.000000e+00 : f32
    %146 = vector.broadcast %cst_40 : f32 to vector<4x64xf32>
    %147 = arith.addf %146, %145 : vector<4x64xf32>
    %148 = arith.divf %146, %147 : vector<4x64xf32>
    %149 = vector.extract_strided_slice %148 {offsets = [0, 0], sizes = [4, 32], strides = [1, 1]} : vector<4x64xf32> to vector<4x32xf32>
    %150 = vector.extract_strided_slice %148 {offsets = [0, 32], sizes = [4, 32], strides = [1, 1]} : vector<4x64xf32> to vector<4x32xf32>
    %151 = vector.extract_strided_slice %36 {offsets = [0, 64], sizes = [4, 32], strides = [1, 1]} : vector<4x96xf32> to vector<4x32xf32>
    %152 = vector.extract_strided_slice %140 {offsets = [0, 64], sizes = [4, 32], strides = [1, 1]} : vector<4x96xf32> to vector<4x32xf32>
    %153 = arith.mulf %149, %152 : vector<4x32xf32>
    %154 = arith.addf %151, %153 : vector<4x32xf32>
    %155 = math.tanh %154 : vector<4x32xf32>
    %156 = arith.subf %134, %155 : vector<4x32xf32>
    %157 = arith.mulf %150, %156 : vector<4x32xf32>
    %158 = arith.addf %155, %157 : vector<4x32xf32>
    %cst_41 = arith.constant 0.000000e+00 : f32
    %159 = vector.broadcast %cst_41 : f32 to vector<4x32xf32>
    %160 = arith.select %61, %158, %159 : vector<4x32xi1>, vector<4x32xf32>
    %161 = arith.select %61, %158, %134 : vector<4x32xi1>, vector<4x32xf32>
    %162 = vector.extract_strided_slice %160 {offsets = [0, 0], sizes = [2, 32], strides = [1, 1]} : vector<4x32xf32> to vector<2x32xf32>
    %163 = vector.extract_strided_slice %160 {offsets = [2, 0], sizes = [2, 32], strides = [1, 1]} : vector<4x32xf32> to vector<2x32xf32>
    %164 = arith.truncf %161 : vector<4x32xf32> to vector<4x32xbf16>
    %cst_42 = arith.constant dense<0.000000e+00> : vector<4x96xf32>
    %165 = tpu.matmul %164, %77, %cst_42 {dimension_numbers = #tpu.dot_dimension_numbers<[1], [0], [0], [1], [0, 0, 1, 1], [], []>} : vector<4x32xbf16>, vector<32x96xbf16>, vector<4x96xf32> -> vector<4x96xf32>
    %cst_43 = arith.constant dense<0.000000e+00> : vector<4x96xf32>
    %166 = tpu.matmul %164, %78, %cst_43 {dimension_numbers = #tpu.dot_dimension_numbers<[1], [0], [0], [1], [0, 0, 1, 1], [], []>} : vector<4x32xbf16>, vector<32x96xbf16>, vector<4x96xf32> -> vector<4x96xf32>
    %167 = arith.select %81, %165, %166 : vector<4x96xi1>, vector<4x96xf32>
    %168 = vector.extract_strided_slice %39 {offsets = [0, 0], sizes = [4, 64], strides = [1, 1]} : vector<4x96xf32> to vector<4x64xf32>
    %169 = vector.extract_strided_slice %167 {offsets = [0, 0], sizes = [4, 64], strides = [1, 1]} : vector<4x96xf32> to vector<4x64xf32>
    %170 = arith.addf %168, %169 : vector<4x64xf32>
    %171 = arith.negf %170 : vector<4x64xf32>
    %172 = math.exp %171 : vector<4x64xf32>
    %cst_44 = arith.constant 1.000000e+00 : f32
    %173 = vector.broadcast %cst_44 : f32 to vector<4x64xf32>
    %174 = arith.addf %173, %172 : vector<4x64xf32>
    %175 = arith.divf %173, %174 : vector<4x64xf32>
    %176 = vector.extract_strided_slice %175 {offsets = [0, 0], sizes = [4, 32], strides = [1, 1]} : vector<4x64xf32> to vector<4x32xf32>
    %177 = vector.extract_strided_slice %175 {offsets = [0, 32], sizes = [4, 32], strides = [1, 1]} : vector<4x64xf32> to vector<4x32xf32>
    %178 = vector.extract_strided_slice %39 {offsets = [0, 64], sizes = [4, 32], strides = [1, 1]} : vector<4x96xf32> to vector<4x32xf32>
    %179 = vector.extract_strided_slice %167 {offsets = [0, 64], sizes = [4, 32], strides = [1, 1]} : vector<4x96xf32> to vector<4x32xf32>
    %180 = arith.mulf %176, %179 : vector<4x32xf32>
    %181 = arith.addf %178, %180 : vector<4x32xf32>
    %182 = math.tanh %181 : vector<4x32xf32>
    %183 = arith.subf %161, %182 : vector<4x32xf32>
    %184 = arith.mulf %177, %183 : vector<4x32xf32>
    %185 = arith.addf %182, %184 : vector<4x32xf32>
    %cst_45 = arith.constant 0.000000e+00 : f32
    %186 = vector.broadcast %cst_45 : f32 to vector<4x32xf32>
    %187 = arith.select %64, %185, %186 : vector<4x32xi1>, vector<4x32xf32>
    %188 = arith.select %64, %185, %161 : vector<4x32xi1>, vector<4x32xf32>
    %189 = vector.extract_strided_slice %187 {offsets = [0, 0], sizes = [2, 32], strides = [1, 1]} : vector<4x32xf32> to vector<2x32xf32>
    %190 = vector.extract_strided_slice %187 {offsets = [2, 0], sizes = [2, 32], strides = [1, 1]} : vector<4x32xf32> to vector<2x32xf32>
    %191 = arith.truncf %188 : vector<4x32xf32> to vector<4x32xbf16>
    %cst_46 = arith.constant dense<0.000000e+00> : vector<4x96xf32>
    %192 = tpu.matmul %191, %77, %cst_46 {dimension_numbers = #tpu.dot_dimension_numbers<[1], [0], [0], [1], [0, 0, 1, 1], [], []>} : vector<4x32xbf16>, vector<32x96xbf16>, vector<4x96xf32> -> vector<4x96xf32>
    %cst_47 = arith.constant dense<0.000000e+00> : vector<4x96xf32>
    %193 = tpu.matmul %191, %78, %cst_47 {dimension_numbers = #tpu.dot_dimension_numbers<[1], [0], [0], [1], [0, 0, 1, 1], [], []>} : vector<4x32xbf16>, vector<32x96xbf16>, vector<4x96xf32> -> vector<4x96xf32>
    %194 = arith.select %81, %192, %193 : vector<4x96xi1>, vector<4x96xf32>
    %195 = vector.extract_strided_slice %42 {offsets = [0, 0], sizes = [4, 64], strides = [1, 1]} : vector<4x96xf32> to vector<4x64xf32>
    %196 = vector.extract_strided_slice %194 {offsets = [0, 0], sizes = [4, 64], strides = [1, 1]} : vector<4x96xf32> to vector<4x64xf32>
    %197 = arith.addf %195, %196 : vector<4x64xf32>
    %198 = arith.negf %197 : vector<4x64xf32>
    %199 = math.exp %198 : vector<4x64xf32>
    %cst_48 = arith.constant 1.000000e+00 : f32
    %200 = vector.broadcast %cst_48 : f32 to vector<4x64xf32>
    %201 = arith.addf %200, %199 : vector<4x64xf32>
    %202 = arith.divf %200, %201 : vector<4x64xf32>
    %203 = vector.extract_strided_slice %202 {offsets = [0, 0], sizes = [4, 32], strides = [1, 1]} : vector<4x64xf32> to vector<4x32xf32>
    %204 = vector.extract_strided_slice %202 {offsets = [0, 32], sizes = [4, 32], strides = [1, 1]} : vector<4x64xf32> to vector<4x32xf32>
    %205 = vector.extract_strided_slice %42 {offsets = [0, 64], sizes = [4, 32], strides = [1, 1]} : vector<4x96xf32> to vector<4x32xf32>
    %206 = vector.extract_strided_slice %194 {offsets = [0, 64], sizes = [4, 32], strides = [1, 1]} : vector<4x96xf32> to vector<4x32xf32>
    %207 = arith.mulf %203, %206 : vector<4x32xf32>
    %208 = arith.addf %205, %207 : vector<4x32xf32>
    %209 = math.tanh %208 : vector<4x32xf32>
    %210 = arith.subf %188, %209 : vector<4x32xf32>
    %211 = arith.mulf %204, %210 : vector<4x32xf32>
    %212 = arith.addf %209, %211 : vector<4x32xf32>
    %cst_49 = arith.constant 0.000000e+00 : f32
    %213 = vector.broadcast %cst_49 : f32 to vector<4x32xf32>
    %214 = arith.select %67, %212, %213 : vector<4x32xi1>, vector<4x32xf32>
    %215 = arith.select %67, %212, %188 : vector<4x32xi1>, vector<4x32xf32>
    %216 = vector.extract_strided_slice %214 {offsets = [0, 0], sizes = [2, 32], strides = [1, 1]} : vector<4x32xf32> to vector<2x32xf32>
    %217 = vector.extract_strided_slice %214 {offsets = [2, 0], sizes = [2, 32], strides = [1, 1]} : vector<4x32xf32> to vector<2x32xf32>
    %218 = arith.truncf %215 : vector<4x32xf32> to vector<4x32xbf16>
    %cst_50 = arith.constant dense<0.000000e+00> : vector<4x96xf32>
    %219 = tpu.matmul %218, %77, %cst_50 {dimension_numbers = #tpu.dot_dimension_numbers<[1], [0], [0], [1], [0, 0, 1, 1], [], []>} : vector<4x32xbf16>, vector<32x96xbf16>, vector<4x96xf32> -> vector<4x96xf32>
    %cst_51 = arith.constant dense<0.000000e+00> : vector<4x96xf32>
    %220 = tpu.matmul %218, %78, %cst_51 {dimension_numbers = #tpu.dot_dimension_numbers<[1], [0], [0], [1], [0, 0, 1, 1], [], []>} : vector<4x32xbf16>, vector<32x96xbf16>, vector<4x96xf32> -> vector<4x96xf32>
    %221 = arith.select %81, %219, %220 : vector<4x96xi1>, vector<4x96xf32>
    %222 = vector.extract_strided_slice %45 {offsets = [0, 0], sizes = [4, 64], strides = [1, 1]} : vector<4x96xf32> to vector<4x64xf32>
    %223 = vector.extract_strided_slice %221 {offsets = [0, 0], sizes = [4, 64], strides = [1, 1]} : vector<4x96xf32> to vector<4x64xf32>
    %224 = arith.addf %222, %223 : vector<4x64xf32>
    %225 = arith.negf %224 : vector<4x64xf32>
    %226 = math.exp %225 : vector<4x64xf32>
    %cst_52 = arith.constant 1.000000e+00 : f32
    %227 = vector.broadcast %cst_52 : f32 to vector<4x64xf32>
    %228 = arith.addf %227, %226 : vector<4x64xf32>
    %229 = arith.divf %227, %228 : vector<4x64xf32>
    %230 = vector.extract_strided_slice %229 {offsets = [0, 0], sizes = [4, 32], strides = [1, 1]} : vector<4x64xf32> to vector<4x32xf32>
    %231 = vector.extract_strided_slice %229 {offsets = [0, 32], sizes = [4, 32], strides = [1, 1]} : vector<4x64xf32> to vector<4x32xf32>
    %232 = vector.extract_strided_slice %45 {offsets = [0, 64], sizes = [4, 32], strides = [1, 1]} : vector<4x96xf32> to vector<4x32xf32>
    %233 = vector.extract_strided_slice %221 {offsets = [0, 64], sizes = [4, 32], strides = [1, 1]} : vector<4x96xf32> to vector<4x32xf32>
    %234 = arith.mulf %230, %233 : vector<4x32xf32>
    %235 = arith.addf %232, %234 : vector<4x32xf32>
    %236 = math.tanh %235 : vector<4x32xf32>
    %237 = arith.subf %215, %236 : vector<4x32xf32>
    %238 = arith.mulf %231, %237 : vector<4x32xf32>
    %239 = arith.addf %236, %238 : vector<4x32xf32>
    %cst_53 = arith.constant 0.000000e+00 : f32
    %240 = vector.broadcast %cst_53 : f32 to vector<4x32xf32>
    %241 = arith.select %70, %239, %240 : vector<4x32xi1>, vector<4x32xf32>
    %242 = arith.select %70, %239, %215 : vector<4x32xi1>, vector<4x32xf32>
    %243 = vector.extract_strided_slice %241 {offsets = [0, 0], sizes = [2, 32], strides = [1, 1]} : vector<4x32xf32> to vector<2x32xf32>
    %244 = vector.extract_strided_slice %241 {offsets = [2, 0], sizes = [2, 32], strides = [1, 1]} : vector<4x32xf32> to vector<2x32xf32>
    %245 = arith.truncf %242 : vector<4x32xf32> to vector<4x32xbf16>
    %cst_54 = arith.constant dense<0.000000e+00> : vector<4x96xf32>
    %246 = tpu.matmul %245, %77, %cst_54 {dimension_numbers = #tpu.dot_dimension_numbers<[1], [0], [0], [1], [0, 0, 1, 1], [], []>} : vector<4x32xbf16>, vector<32x96xbf16>, vector<4x96xf32> -> vector<4x96xf32>
    %cst_55 = arith.constant dense<0.000000e+00> : vector<4x96xf32>
    %247 = tpu.matmul %245, %78, %cst_55 {dimension_numbers = #tpu.dot_dimension_numbers<[1], [0], [0], [1], [0, 0, 1, 1], [], []>} : vector<4x32xbf16>, vector<32x96xbf16>, vector<4x96xf32> -> vector<4x96xf32>
    %248 = arith.select %81, %246, %247 : vector<4x96xi1>, vector<4x96xf32>
    %249 = vector.extract_strided_slice %48 {offsets = [0, 0], sizes = [4, 64], strides = [1, 1]} : vector<4x96xf32> to vector<4x64xf32>
    %250 = vector.extract_strided_slice %248 {offsets = [0, 0], sizes = [4, 64], strides = [1, 1]} : vector<4x96xf32> to vector<4x64xf32>
    %251 = arith.addf %249, %250 : vector<4x64xf32>
    %252 = arith.negf %251 : vector<4x64xf32>
    %253 = math.exp %252 : vector<4x64xf32>
    %cst_56 = arith.constant 1.000000e+00 : f32
    %254 = vector.broadcast %cst_56 : f32 to vector<4x64xf32>
    %255 = arith.addf %254, %253 : vector<4x64xf32>
    %256 = arith.divf %254, %255 : vector<4x64xf32>
    %257 = vector.extract_strided_slice %256 {offsets = [0, 0], sizes = [4, 32], strides = [1, 1]} : vector<4x64xf32> to vector<4x32xf32>
    %258 = vector.extract_strided_slice %256 {offsets = [0, 32], sizes = [4, 32], strides = [1, 1]} : vector<4x64xf32> to vector<4x32xf32>
    %259 = vector.extract_strided_slice %48 {offsets = [0, 64], sizes = [4, 32], strides = [1, 1]} : vector<4x96xf32> to vector<4x32xf32>
    %260 = vector.extract_strided_slice %248 {offsets = [0, 64], sizes = [4, 32], strides = [1, 1]} : vector<4x96xf32> to vector<4x32xf32>
    %261 = arith.mulf %257, %260 : vector<4x32xf32>
    %262 = arith.addf %259, %261 : vector<4x32xf32>
    %263 = math.tanh %262 : vector<4x32xf32>
    %264 = arith.subf %242, %263 : vector<4x32xf32>
    %265 = arith.mulf %258, %264 : vector<4x32xf32>
    %266 = arith.addf %263, %265 : vector<4x32xf32>
    %cst_57 = arith.constant 0.000000e+00 : f32
    %267 = vector.broadcast %cst_57 : f32 to vector<4x32xf32>
    %268 = arith.select %73, %266, %267 : vector<4x32xi1>, vector<4x32xf32>
    %269 = arith.select %73, %266, %242 : vector<4x32xi1>, vector<4x32xf32>
    %270 = vector.extract_strided_slice %268 {offsets = [0, 0], sizes = [2, 32], strides = [1, 1]} : vector<4x32xf32> to vector<2x32xf32>
    %271 = vector.extract_strided_slice %268 {offsets = [2, 0], sizes = [2, 32], strides = [1, 1]} : vector<4x32xf32> to vector<2x32xf32>
    %272 = arith.truncf %269 : vector<4x32xf32> to vector<4x32xbf16>
    %cst_58 = arith.constant dense<0.000000e+00> : vector<4x96xf32>
    %273 = tpu.matmul %272, %77, %cst_58 {dimension_numbers = #tpu.dot_dimension_numbers<[1], [0], [0], [1], [0, 0, 1, 1], [], []>} : vector<4x32xbf16>, vector<32x96xbf16>, vector<4x96xf32> -> vector<4x96xf32>
    %cst_59 = arith.constant dense<0.000000e+00> : vector<4x96xf32>
    %274 = tpu.matmul %272, %78, %cst_59 {dimension_numbers = #tpu.dot_dimension_numbers<[1], [0], [0], [1], [0, 0, 1, 1], [], []>} : vector<4x32xbf16>, vector<32x96xbf16>, vector<4x96xf32> -> vector<4x96xf32>
    %275 = arith.select %81, %273, %274 : vector<4x96xi1>, vector<4x96xf32>
    %276 = vector.extract_strided_slice %51 {offsets = [0, 0], sizes = [4, 64], strides = [1, 1]} : vector<4x96xf32> to vector<4x64xf32>
    %277 = vector.extract_strided_slice %275 {offsets = [0, 0], sizes = [4, 64], strides = [1, 1]} : vector<4x96xf32> to vector<4x64xf32>
    %278 = arith.addf %276, %277 : vector<4x64xf32>
    %279 = arith.negf %278 : vector<4x64xf32>
    %280 = math.exp %279 : vector<4x64xf32>
    %cst_60 = arith.constant 1.000000e+00 : f32
    %281 = vector.broadcast %cst_60 : f32 to vector<4x64xf32>
    %282 = arith.addf %281, %280 : vector<4x64xf32>
    %283 = arith.divf %281, %282 : vector<4x64xf32>
    %284 = vector.extract_strided_slice %283 {offsets = [0, 0], sizes = [4, 32], strides = [1, 1]} : vector<4x64xf32> to vector<4x32xf32>
    %285 = vector.extract_strided_slice %283 {offsets = [0, 32], sizes = [4, 32], strides = [1, 1]} : vector<4x64xf32> to vector<4x32xf32>
    %286 = vector.extract_strided_slice %51 {offsets = [0, 64], sizes = [4, 32], strides = [1, 1]} : vector<4x96xf32> to vector<4x32xf32>
    %287 = vector.extract_strided_slice %275 {offsets = [0, 64], sizes = [4, 32], strides = [1, 1]} : vector<4x96xf32> to vector<4x32xf32>
    %288 = arith.mulf %284, %287 : vector<4x32xf32>
    %289 = arith.addf %286, %288 : vector<4x32xf32>
    %290 = math.tanh %289 : vector<4x32xf32>
    %291 = arith.subf %269, %290 : vector<4x32xf32>
    %292 = arith.mulf %285, %291 : vector<4x32xf32>
    %293 = arith.addf %290, %292 : vector<4x32xf32>
    %cst_61 = arith.constant 0.000000e+00 : f32
    %294 = vector.broadcast %cst_61 : f32 to vector<4x32xf32>
    %295 = arith.select %76, %293, %294 : vector<4x32xi1>, vector<4x32xf32>
    %296 = vector.extract_strided_slice %295 {offsets = [0, 0], sizes = [2, 32], strides = [1, 1]} : vector<4x32xf32> to vector<2x32xf32>
    %297 = vector.extract_strided_slice %295 {offsets = [2, 0], sizes = [2, 32], strides = [1, 1]} : vector<4x32xf32> to vector<2x32xf32>
    %298 = tpu.concatenate %108, %297 in 1 : vector<2x32xf32>, vector<2x32xf32> -> vector<2x64xf32>
    %299 = tpu.concatenate %135, %271 in 1 : vector<2x32xf32>, vector<2x32xf32> -> vector<2x64xf32>
    %300 = tpu.concatenate %162, %244 in 1 : vector<2x32xf32>, vector<2x32xf32> -> vector<2x64xf32>
    %301 = tpu.concatenate %189, %217 in 1 : vector<2x32xf32>, vector<2x32xf32> -> vector<2x64xf32>
    %302 = tpu.concatenate %216, %190 in 1 : vector<2x32xf32>, vector<2x32xf32> -> vector<2x64xf32>
    %303 = tpu.concatenate %243, %163 in 1 : vector<2x32xf32>, vector<2x32xf32> -> vector<2x64xf32>
    %304 = tpu.concatenate %270, %136 in 1 : vector<2x32xf32>, vector<2x32xf32> -> vector<2x64xf32>
    %305 = tpu.concatenate %296, %109 in 1 : vector<2x32xf32>, vector<2x32xf32> -> vector<2x64xf32>
    %306 = tpu.concatenate %298, %299, %300, %301, %302, %303, %304, %305 in 0 : vector<2x64xf32>, vector<2x64xf32>, vector<2x64xf32>, vector<2x64xf32>, vector<2x64xf32>, vector<2x64xf32>, vector<2x64xf32>, vector<2x64xf32> -> vector<16x64xf32>
    %c0_62 = arith.constant 0 : index
    %c0_63 = arith.constant 0 : index
    %307 = vector.load %arg8[%c0_62, %c0_63] : memref<16x64xf32, #tpu.memory_space<vmem>>, vector<16x64xf32>
    tpu.vector_store %arg8[%c0_62, %c0_63], %306 {strides = array<i32>} : memref<16x64xf32, #tpu.memory_space<vmem>>, vector<16x64xf32>,
    return
  }
}

</mosaic_0001>

<bundles_post_ra>
// kernel: bi_gru_layer.1
= control target key start
LH: loop header
LB: loop body
LE: loop exit
PB: predicated region body
PF: predicated region fallthrough
CT: control target
= control target key end

     0   :  { %vm33_vm0 = vcmask 261120   ;;  %s2135_s0 = inlined_call_operand.vmem [shape: f32[16,32], index: 0, kind: input, shape index: {}]   ;;  %s2136_s1 = inlined_call_operand.vmem [shape: f32[32,32], index: 1, kind: input, shape index: {}]   ;;  %s2137_s2 = inlined_call_operand.vmem [shape: f32[1,32], index: 2, kind: input, shape index: {}]   ;;  %s2138_s3 = inlined_call_operand.vmem [shape: f32[1,32], index: 3, kind: input, shape index: {}]   ;;  %s2139_s4 = inlined_call_operand.vmem [shape: bf16[32,96], index: 4, kind: input, shape index: {}]   ;;  %s2140_s5 = inlined_call_operand.vmem [shape: bf16[32,96], index: 5, kind: input, shape index: {}]   ;;  %s2141_s6 = inlined_call_operand.vmem [shape: bf16[32,96], index: 6, kind: input, shape index: {}]   ;;  %s2142_s7 = inlined_call_operand.vmem [shape: bf16[32,96], index: 7, kind: input, shape index: {}]   ;;  %s2143_s8 = inlined_call_operand.hbm [shape: f32[16,64], index: 8, kind: output, shape index: {}]  }
   0x1   :  { %v31_v0 = vld [vmem:[%s2135_s0] sm:$0xff]  ;;  %v32_v1 = vld [vmem:[%s2135_s0 + $0x8] sm:$0xff] }
   0x2   :  { %v34_v2 = vsel %vm33_vm0, %v31_v0, 0.0  ;;  %v37_v3 = vsel %vm33_vm0, %v32_v1, 0.0 }
   0x3   :  { %35 = vadd.xlane.f32.xlu0 %v34_v2 }
   0x7   :  { %38 = vadd.xlane.f32.xlu0 %v37_v3 }
   0x8   :  { %13 = vsyncpa [#allocation3], 0  ;;  %v1629_v14 = vld [vmem:[%s2139_s4 + $0x8] sm:$0xff]   ;;  %v1711_v16 = vmov 0.0   ;;  %v1631_v17 = vld [vmem:[%s2139_s4] sm:$0xff]   ;;  %vm1712_vm1 = vmmov 0   ;;  %v250_v41 = vlaneseq }
   0x9   :  { %v1630_v15 = vld [vmem:[%s2140_s5 + $0x8] sm:$0xff]   ;;  %1476 = vmatprep.subr.bf16.mxu0 %v1711_v16  ;;  %1484 = vmatprep.subr.bf16.mxu1 %v1711_v16  ;;  %v1632_v18 = vld [vmem:[%s2140_s5] sm:$0xff]   ;;  %v1713_v40 = vmov 0   ;;  %vm200_vm2 = vcmask 1041408   ;;  %s1716_s24 = smov 32   ;;  %vm1362_vm8 = vcmask 1043456  }
   0xa   :  { %1477 = vmatpush3.bf16.msra.mxu0 %v1629_v14  ;;  %1485 = vmatpush3.bf16.msra.mxu1 %v1630_v15  ;;  %v1388_v27 = vld [vmem:[%s2137_s2] ss:$0 sm:$0xff]  ;;  %v1806_v35 = vld [vmem:[%s2141_s6 + $0x8] sm:$0xff]   ;;  %v1849_v42 = vshrl.u32 %v250_v41, 7  ;;  %vm1364_vm9 = vcmask 1045504   ;;  %vm1369_vm10 = vcmask 523264  }
   0xb   :  { %1478 = vmatprep.subr.bf16.mxu0 %v1711_v16  ;;  %1486 = vmatprep.subr.bf16.mxu1 %v1711_v16  ;;  %v1389_v31 = vld [vmem:[%s2138_s3] ss:$0 sm:$0xff]  ;;  %v1811_v36 = vld [vmem:[%s2142_s7 + $0x8] sm:$0xff]  }
   0xc   :  { %1480 = vmatprep.mubr.msk.bf16.mxu0 %vm1712_vm1, %v1711_v16  ;;  %1488 = vmatprep.mubr.msk.bf16.mxu1 %vm1712_vm1, %v1711_v16  ;;  %v1820_v38 = vld [vmem:[%s2141_s6] sm:$0xff]   ;;  %vm252_vm3 = vcmp.lt.s32.totalorder %v1849_v42, 2  ;;  %s1714_s6 = smov 64  }
   0xd   :  { %v1825_v39 = vld [vmem:[%s2142_s7] sm:$0xff]   ;;  %s1715_s7 = smov 96  }
   0xe   :  { %1479 = vmatpush3.bf16.msra.mxu0 %v1631_v17  ;;  %1487 = vmatpush3.bf16.msra.mxu1 %v1632_v18 }
   0xf   :  { %1492 = vmatprep.subr.bf16.mxu0 %v1711_v16  ;;  %1500 = vmatprep.subr.bf16.mxu1 %v1711_v16 }
  0x8c   :  { %v36_v4 = vpop.xlane.xlu0 %35 }
  0x8d   :  { %v41_v5 = vmul.f32 0.03125, %v36_v4 }
  0x8f   :  { %v43_v6 = vsub.f32 %v31_v0, %v41_v5 }
  0x90   :  { %v39_v7 = vpop.xlane.xlu0 %38 }
  0x91   :  { %v42_v8 = vmul.f32 0.03125, %v39_v7  ;;  %v45_v9 = vmul.f32 %v43_v6, %v43_v6 }
  0x93   :  { %v44_v10 = vsub.f32 %v32_v1, %v42_v8  ;;  %v47_v11 = vsel %vm33_vm0, %v45_v9, 0.0 }
  0x94   :  { %48 = vadd.xlane.f32.xlu1 %v47_v11 }
  0x95   :  { %v46_v12 = vmul.f32 %v44_v10, %v44_v10 }
  0x97   :  { %v50_v13 = vsel %vm33_vm0, %v46_v12, 0.0 }
  0x98   :  { %51 = vadd.xlane.f32.xlu1 %v50_v13 }
 0x11d   :  { %v49_v19 = vpop.xlane.xlu1 %48 }
 0x11e   :  { %v53_v20 = vmul.f32 0.03125, %v49_v19 }
 0x120   :  { %v55_v21 = vadd.f32 1e-05, %v53_v20 }
 0x121   :  { %v52_v22 = vpop.xlane.xlu1 %51 }
 0x122   :  { %1637 = vrsqrt.f32 %v55_v21  ;;  %v54_v23 = vmul.f32 0.03125, %v52_v22 }
 0x124   :  { %v56_v24 = vadd.f32 1e-05, %v54_v23 }
 0x126   :  { %1639 = vrsqrt.f32 %v56_v24 }
 0x12f   :  { %v1638_v25 = vpop.eup %1637 }
 0x130   :  { %v59_v26 = vmul.f32 %v1638_v25, %v43_v6 }
 0x132   :  { %v68_v30 = vmul.f32 %v1388_v27, %v59_v26 }
 0x133   :  { %v1640_v28 = vpop.eup %1639 }
 0x134   :  { %v60_v29 = vmul.f32 %v1640_v28, %v44_v10  ;;  %v77_v33 = vadd.f32 %v1389_v31, %v68_v30 }
 0x136   :  { %v69_v32 = vmul.f32 %v1388_v27, %v60_v29 }
 0x138   :  { %v78_v34 = vadd.f32 %v1389_v31, %v69_v32  ;;  %v1883_v32 = vld [vmem:[%s2136_s1] sm:$0xff] }
 0x139   :  { %vm238_vm4 = vcmp.gt.f32.partialorder %v1883_v32, 0.5 }
 0x13a   :  { %v79_v37 = vpack.c.bf16 %v78_v34, %v77_v33 }
 0x13c   :  { %1481 = vmatmul.mubr.msk.bf16.vlgmr.msra.gmra.mxu0 %vm33_vm0, %v79_v37  ;;  %1489 = vmatmul.mubr.msk.bf16.vlgmr.msra.gmra.mxu1 %vm33_vm0, %v79_v37 }
 0x13d   :  { %1493 = vmatpush3.bf16.msra.mxu0 %v1806_v35  ;;  %1501 = vmatpush3.bf16.msra.mxu1 %v1811_v36 }
 0x13e   :  { %1494 = vmatprep.subr.bf16.mxu0 %v1711_v16  ;;  %1502 = vmatprep.subr.bf16.mxu1 %v1711_v16 }
 0x13f   :  { %1496 = vmatprep.mubr.msk.bf16.mxu0 %vm1712_vm1, %v1711_v16  ;;  %1504 = vmatprep.mubr.msk.bf16.mxu1 %vm1712_vm1, %v1711_v16 }
 0x141   :  { %1495 = vmatpush3.bf16.msra.mxu0 %v1820_v38  ;;  %1503 = vmatpush3.bf16.msra.mxu1 %v1825_v39 }
 0x142   :  { %1508 = vmatprep.subr.bf16.mxu0 %v1711_v16  ;;  %1516 = vmatprep.subr.bf16.mxu1 %v1711_v16 }
 0x144   :  { %1497 = vmatmul.mubr.bf16.vlgmr.msra.gmra.mxu0 %v1713_v40  ;;  %1505 = vmatmul.mubr.bf16.vlgmr.msra.gmra.mxu1 %v1713_v40 }
 0x145   :  { %1509 = vmatpush3.bf16.msra.mxu0 %v1806_v35  ;;  %1517 = vmatpush3.bf16.msra.mxu1 %v1811_v36 }
 0x146   :  { %1510 = vmatprep.subr.bf16.mxu0 %v1711_v16  ;;  %1518 = vmatprep.subr.bf16.mxu1 %v1711_v16 }
 0x147   :  { %1512 = vmatprep.mubr.msk.bf16.mxu0 %vm1712_vm1, %v1711_v16  ;;  %1520 = vmatprep.mubr.msk.bf16.mxu1 %vm1712_vm1, %v1711_v16 }
 0x149   :  { %1511 = vmatpush3.bf16.msra.mxu0 %v1820_v38  ;;  %1519 = vmatpush3.bf16.msra.mxu1 %v1825_v39 }
 0x14a   :  { %1524 = vmatprep.subr.bf16.mxu0 %v1711_v16  ;;  %1532 = vmatprep.subr.bf16.mxu1 %v1711_v16 }
 0x1fc   :  { %v133_v43 = vpop.f32.mrf.mxu0  ;;  %v190_v44 = vpop.f32.mrf.mxu1 }
 0x1fd   :  { %v203_v47 = vrot.slane %v133_v43, 2  ;;  %v208_v48 = vrot.slane %v133_v43, 4  ;;  %v211_v49 = vrot.slane %v133_v43, 6  ;;  %v217_v50 = vrot.slane %v190_v44, 4 }
 0x1fe   :  { %v1482_v45 = vpop.f32.mrf.mxu0  ;;  %v1490_v46 = vpop.f32.mrf.mxu1  ;;  %v223_v51 = vrot.slane %v190_v44, 2  ;;  %v231_v52 = vrot.slane %v190_v44, 6 }
 0x200   :  { %v136_v53 = vpop.f32.mrf.mxu0  ;;  %v193_v54 = vpop.f32.mrf.mxu1 }
 0x201   :  { %v221_v55 = vrot.slane %v136_v53, 2  ;;  %v226_v56 = vrot.slane %v136_v53, 4  ;;  %v229_v57 = vrot.slane %v136_v53, 6  ;;  %v198_v58 = vrot.slane %v193_v54, 4 }
 0x202   :  { %v205_v59 = vrot.slane %v193_v54, 2  ;;  %v213_v60 = vrot.slane %v193_v54, 6  ;;  %v1483_v61 = vpop.f32.mrf.mxu0  ;;  %v1491_v62 = vpop.f32.mrf.mxu1  ;;  %v1853_v63 = vsel %vm200_vm2, %v208_v48, %v193_v54  ;;  %v1856_v0 = vsel %vm200_vm2, %v136_v53, %v217_v50 }
 0x203   :  { %v201_v1 = vsel %vm200_vm2, %v133_v43, %v198_v58  ;;  %v1860_v2 = vsel %vm200_vm2, %v221_v55, %v223_v51  ;;  %v1863_v3 = vsel %vm200_vm2, %v226_v56, %v190_v44  ;;  %v1866_v4 = vsel %vm200_vm2, %v229_v57, %v231_v52 }
 0x204   :  { %v302_v5 = vpop.f32.mrf.mxu0  ;;  %v354_v6 = vpop.f32.mrf.mxu1  ;;  %v1869_v7 = vsel %vm200_vm2, %v203_v47, %v205_v59  ;;  %v1872_v8 = vsel %vm200_vm2, %v211_v49, %v213_v60 }
 0x205   :  { %v360_v9 = vsel %vm252_vm3, %v302_v5, %v354_v6 }
 0x206   :  { %v1506_v10 = vpop.f32.mrf.mxu1  ;;  %369 = vrot.lane.b32.xlu0 %v360_v9, %s1714_s6  ;;  %v1498_v11 = vpop.f32.mrf.mxu0  ;;  %v361_v17 = vadd.f32 %v360_v9, %v201_v1 }
 0x208   :  { %v305_v12 = vpop.f32.mrf.mxu0  ;;  %v357_v13 = vpop.f32.mrf.mxu1  ;;  %v1400_v18 = vmul.f32 -1.442695, %v361_v17 }
 0x20a   :  { %v1499_v14 = vpop.f32.mrf.mxu0  ;;  %v1507_v15 = vpop.f32.mrf.mxu1  ;;  %1641 = vpow2.f32 %v1400_v18 }
 0x217   :  { %v1642_v19 = vpop.eup %1641 }
 0x218   :  { %v365_v20 = vadd.f32 1.0, %v1642_v19 }
 0x21a   :  { %1643 = vrcp.f32 %v365_v20 }
 0x227   :  { %v1644_v21 = vpop.eup %1643 }
 0x278   :  { %v370_v22 = vpop.permute.xlu0 %369 }
 0x279   :  { %v372_v23 = vmul.f32 %v1644_v21, %v370_v22 }
 0x27b   :  { %374 = vrot.lane.b32.xlu1 %v372_v23, %s1714_s6 }
 0x2ed   :  { %v375_v24 = vpop.permute.xlu1 %374 }
 0x2ee   :  { %v377_v25 = vadd.f32 %v375_v24, %v201_v1 }
 0x2f0   :  { %1645 = vtanh.f32 %v377_v25 }
 0x2fd   :  { %v1646_v26 = vpop.eup %1645 }
 0x2fe   :  { %v379_v27 = vsub.f32 0.0, %v1646_v26 }
 0x300   :  { %381 = vrot.lane.b32.xlu1 %v379_v27, %s1715_s7 }
 0x372   :  { %v382_v28 = vpop.permute.xlu1 %381 }
 0x373   :  { %v384_v29 = vmul.f32 %v1644_v21, %v382_v28 }
 0x375   :  { %386 = vrot.lane.b32.xlu1 %v384_v29, %s1716_s24 }
 0x3e7   :  { %v387_v30 = vpop.permute.xlu1 %386 }
 0x3e8   :  { %v389_v31 = vadd.f32 %v1646_v26, %v387_v30 }
 0x3ea   :  { %391 = vrot.lane.b32.xlu0 %v389_v31, %s1714_s6 }
 0x45c   :  { %v392_v33 = vpop.permute.xlu0 %391 }
 0x45d   :  { %v1888_v34 = vsel %vm238_vm4, %v392_v33, 0.0 }
 0x45e   :  { %v395_v37 = vpack.c.bf16 %v1888_v34, %v1888_v34 }
 0x460   :  { %1513 = vmatmul.mubr.msk.bf16.vlgmr.msra.gmra.mxu0 %vm33_vm0, %v395_v37  ;;  %1521 = vmatmul.mubr.msk.bf16.vlgmr.msra.gmra.mxu1 %vm33_vm0, %v395_v37 }
 0x461   :  { %1525 = vmatpush3.bf16.msra.mxu0 %v1806_v35  ;;  %1533 = vmatpush3.bf16.msra.mxu1 %v1811_v36 }
 0x462   :  { %1526 = vmatprep.subr.bf16.mxu0 %v1711_v16  ;;  %1534 = vmatprep.subr.bf16.mxu1 %v1711_v16 }
 0x463   :  { %1528 = vmatprep.mubr.msk.bf16.mxu0 %vm1712_vm1, %v1711_v16  ;;  %1536 = vmatprep.mubr.msk.bf16.mxu1 %vm1712_vm1, %v1711_v16 }
 0x465   :  { %1527 = vmatpush3.bf16.msra.mxu0 %v1820_v38  ;;  %1535 = vmatpush3.bf16.msra.mxu1 %v1825_v39 }
 0x466   :  { %1540 = vmatprep.subr.bf16.mxu0 %v1711_v16  ;;  %1548 = vmatprep.subr.bf16.mxu1 %v1711_v16 }
 0x520   :  { %v433_v40 = vpop.f32.mrf.mxu0  ;;  %v473_v41 = vpop.f32.mrf.mxu1 }
 0x521   :  { %v479_v43 = vsel %vm252_vm3, %v433_v40, %v473_v41 }
 0x522   :  { %v1522_v44 = vpop.f32.mrf.mxu1  ;;  %488 = vrot.lane.b32.xlu1 %v479_v43, %s1714_s6  ;;  %v1514_v45 = vpop.f32.mrf.mxu0  ;;  %v480_v50 = vadd.f32 %v479_v43, %v1869_v7 }
 0x524   :  { %v436_v46 = vpop.f32.mrf.mxu0  ;;  %v476_v47 = vpop.f32.mrf.mxu1  ;;  %v1403_v51 = vmul.f32 -1.442695, %v480_v50 }
 0x526   :  { %v1515_v48 = vpop.f32.mrf.mxu0  ;;  %v1523_v49 = vpop.f32.mrf.mxu1  ;;  %1647 = vpow2.f32 %v1403_v51 }
 0x533   :  { %v1648_v52 = vpop.eup %1647 }
 0x534   :  { %v484_v53 = vadd.f32 1.0, %v1648_v52 }
 0x536   :  { %1649 = vrcp.f32 %v484_v53 }
 0x543   :  { %v1650_v54 = vpop.eup %1649 }
 0x594   :  { %v489_v55 = vpop.permute.xlu1 %488 }
 0x595   :  { %v491_v56 = vmul.f32 %v1650_v54, %v489_v55 }
 0x597   :  { %493 = vrot.lane.b32.xlu0 %v491_v56, %s1714_s6 }
 0x609   :  { %v494_v57 = vpop.permute.xlu0 %493 }
 0x60a   :  { %v496_v58 = vadd.f32 %v494_v57, %v1869_v7  ;;  %v520_v7 = vrot.slane %v1888_v34, 4 }
 0x60c   :  { %1651 = vtanh.f32 %v496_v58 }
 0x619   :  { %v1652_v59 = vpop.eup %1651 }
 0x61a   :  { %499 = vrot.lane.b32.xlu1 %v1652_v59, %s1714_s6 }
 0x68c   :  { %v500_v60 = vpop.permute.xlu1 %499 }
 0x68d   :  { %v502_v61 = vsub.f32 %v1888_v34, %v500_v60 }
 0x68f   :  { %504 = vrot.lane.b32.xlu0 %v502_v61, %s1716_s24 }
 0x701   :  { %v505_v62 = vpop.permute.xlu0 %504 }
 0x702   :  { %v507_v1 = vmul.f32 %v1650_v54, %v505_v62 }
 0x704   :  { %509 = vrot.lane.b32.xlu1 %v507_v1, %s1716_s24 }
 0x776   :  { %v510_v5 = vpop.permute.xlu1 %509 }
 0x777   :  { %v512_v6 = vadd.f32 %v1652_v59, %v510_v5 }
 0x779   :  { %v514_v9 = vrot.slane %v512_v6, 4 }
 0x77b   :  { %515 = vrot.lane.b32.xlu0 %v514_v9, %s1714_s6 }
 0x7ed   :  { %v1918_v10 = vpop.permute.xlu0 %515 }
 0x7ee   :  { %v522_v11 = vsel %vm238_vm4, %v1918_v10, %v520_v7 }
 0x7ef   :  { %v523_v12 = vpack.c.bf16 %v522_v11, %v522_v11  ;;  %v651_v49 = vrot.slane %v522_v11, 4 }
 0x7f1   :  { %v525_v13 = vrot.slane %v523_v12, 2 }
 0x7f3   :  { %1529 = vmatmul.mubr.msk.bf16.vlgmr.msra.gmra.mxu0 %vm33_vm0, %v525_v13  ;;  %1537 = vmatmul.mubr.msk.bf16.vlgmr.msra.gmra.mxu1 %vm33_vm0, %v525_v13 }
 0x7f4   :  { %1541 = vmatpush3.bf16.msra.mxu0 %v1806_v35  ;;  %1549 = vmatpush3.bf16.msra.mxu1 %v1811_v36 }
 0x7f5   :  { %1542 = vmatprep.subr.bf16.mxu0 %v1711_v16  ;;  %1550 = vmatprep.subr.bf16.mxu1 %v1711_v16 }
 0x7f6   :  { %1544 = vmatprep.mubr.msk.bf16.mxu0 %vm1712_vm1, %v1711_v16  ;;  %1552 = vmatprep.mubr.msk.bf16.mxu1 %vm1712_vm1, %v1711_v16 }
 0x7f8   :  { %1543 = vmatpush3.bf16.msra.mxu0 %v1820_v38  ;;  %1551 = vmatpush3.bf16.msra.mxu1 %v1825_v39 }
 0x7f9   :  { %1556 = vmatprep.subr.bf16.mxu0 %v1711_v16  ;;  %1564 = vmatprep.subr.bf16.mxu1 %v1711_v16 }
 0x8b3   :  { %v563_v14 = vpop.f32.mrf.mxu0  ;;  %v603_v15 = vpop.f32.mrf.mxu1 }
 0x8b4   :  { %v609_v17 = vsel %vm252_vm3, %v563_v14, %v603_v15 }
 0x8b5   :  { %v1538_v18 = vpop.f32.mrf.mxu1  ;;  %618 = vrot.lane.b32.xlu1 %v609_v17, %s1714_s6  ;;  %v1530_v19 = vpop.f32.mrf.mxu0  ;;  %v610_v24 = vadd.f32 %v609_v17, %v1853_v63 }
 0x8b7   :  { %v566_v20 = vpop.f32.mrf.mxu0  ;;  %v606_v21 = vpop.f32.mrf.mxu1  ;;  %v1406_v25 = vmul.f32 -1.442695, %v610_v24 }
 0x8b9   :  { %v1531_v22 = vpop.f32.mrf.mxu0  ;;  %v1539_v23 = vpop.f32.mrf.mxu1  ;;  %1653 = vpow2.f32 %v1406_v25 }
 0x8c6   :  { %v1654_v26 = vpop.eup %1653 }
 0x8c7   :  { %v614_v27 = vadd.f32 1.0, %v1654_v26 }
 0x8c9   :  { %1655 = vrcp.f32 %v614_v27 }
 0x8d6   :  { %v1656_v28 = vpop.eup %1655 }
 0x927   :  { %v619_v29 = vpop.permute.xlu1 %618 }
 0x928   :  { %v621_v30 = vmul.f32 %v1656_v28, %v619_v29 }
 0x92a   :  { %623 = vrot.lane.b32.xlu0 %v621_v30, %s1714_s6 }
 0x99c   :  { %v624_v31 = vpop.permute.xlu0 %623 }
 0x99d   :  { %v626_v33 = vadd.f32 %v624_v31, %v1853_v63  ;;  %v1950_v63 = vld [vmem:[%s2136_s1 + $0x8] sm:$0xff] }
 0x99e   :  { %vm239_vm5 = vcmp.gt.f32.partialorder %v1950_v63, 0.5 }
 0x99f   :  { %1657 = vtanh.f32 %v626_v33 }
 0x9ac   :  { %v1658_v37 = vpop.eup %1657 }
 0x9ad   :  { %v629_v40 = vrot.slane %v1658_v37, 4 }
 0x9af   :  { %630 = vrot.lane.b32.xlu1 %v629_v40, %s1714_s6 }
 0xa21   :  { %v631_v41 = vpop.permute.xlu1 %630 }
 0xa22   :  { %v633_v43 = vsub.f32 %v522_v11, %v631_v41 }
 0xa24   :  { %v635_v44 = vrot.slane %v633_v43, 4 }
 0xa26   :  { %636 = vrot.lane.b32.xlu0 %v635_v44, %s1716_s24 }
 0xa98   :  { %v637_v45 = vpop.permute.xlu0 %636 }
 0xa99   :  { %v639_v46 = vmul.f32 %v1656_v28, %v637_v45 }
 0xa9b   :  { %641 = vrot.lane.b32.xlu1 %v639_v46, %s1716_s24 }
 0xb0d   :  { %v642_v47 = vpop.permute.xlu1 %641 }
 0xb0e   :  { %v644_v48 = vadd.f32 %v1658_v37, %v642_v47 }
 0xb10   :  { %646 = vrot.lane.b32.xlu0 %v644_v48, %s1714_s6 }
 0xb82   :  { %v1953_v50 = vpop.permute.xlu0 %646 }
 0xb83   :  { %v653_v51 = vsel %vm239_vm5, %v1953_v50, %v651_v49 }
 0xb84   :  { %v654_v52 = vpack.c.bf16 %v653_v51, %v653_v51  ;;  %v779_v23 = vrot.slane %v653_v51, 4 }
 0xb86   :  { %1545 = vmatmul.mubr.msk.bf16.vlgmr.msra.gmra.mxu0 %vm33_vm0, %v654_v52  ;;  %1553 = vmatmul.mubr.msk.bf16.vlgmr.msra.gmra.mxu1 %vm33_vm0, %v654_v52 }
 0xb87   :  { %1557 = vmatpush3.bf16.msra.mxu0 %v1806_v35  ;;  %1565 = vmatpush3.bf16.msra.mxu1 %v1811_v36 }
 0xb88   :  { %1558 = vmatprep.subr.bf16.mxu0 %v1711_v16  ;;  %1566 = vmatprep.subr.bf16.mxu1 %v1711_v16 }
 0xb89   :  { %1560 = vmatprep.mubr.msk.bf16.mxu0 %vm1712_vm1, %v1711_v16  ;;  %1568 = vmatprep.mubr.msk.bf16.mxu1 %vm1712_vm1, %v1711_v16 }
 0xb8b   :  { %1559 = vmatpush3.bf16.msra.mxu0 %v1820_v38  ;;  %1567 = vmatpush3.bf16.msra.mxu1 %v1825_v39 }
 0xb8c   :  { %1572 = vmatprep.subr.bf16.mxu0 %v1711_v16  ;;  %1580 = vmatprep.subr.bf16.mxu1 %v1711_v16 }
 0xc46   :  { %v692_v53 = vpop.f32.mrf.mxu0  ;;  %v732_v54 = vpop.f32.mrf.mxu1 }
 0xc47   :  { %v738_v55 = vsel %vm252_vm3, %v692_v53, %v732_v54 }
 0xc48   :  { %v1554_v56 = vpop.f32.mrf.mxu1  ;;  %747 = vrot.lane.b32.xlu1 %v738_v55, %s1714_s6  ;;  %v1546_v57 = vpop.f32.mrf.mxu0  ;;  %v739_v62 = vadd.f32 %v738_v55, %v1872_v8 }
 0xc4a   :  { %v695_v58 = vpop.f32.mrf.mxu0  ;;  %v735_v59 = vpop.f32.mrf.mxu1  ;;  %v1409_v1 = vmul.f32 -1.442695, %v739_v62 }
 0xc4c   :  { %v1547_v60 = vpop.f32.mrf.mxu0  ;;  %v1555_v61 = vpop.f32.mrf.mxu1  ;;  %1659 = vpow2.f32 %v1409_v1 }
 0xc59   :  { %v1660_v5 = vpop.eup %1659 }
 0xc5a   :  { %v743_v6 = vadd.f32 1.0, %v1660_v5 }
 0xc5c   :  { %1661 = vrcp.f32 %v743_v6 }
 0xc69   :  { %v1662_v9 = vpop.eup %1661 }
 0xcba   :  { %v748_v7 = vpop.permute.xlu1 %747 }
 0xcbb   :  { %v750_v11 = vmul.f32 %v1662_v9, %v748_v7 }
 0xcbd   :  { %752 = vrot.lane.b32.xlu0 %v750_v11, %s1714_s6 }
 0xd2f   :  { %v753_v12 = vpop.permute.xlu0 %752 }
 0xd30   :  { %v755_v13 = vadd.f32 %v753_v12, %v1872_v8 }
 0xd32   :  { %1663 = vtanh.f32 %v755_v13 }
 0xd3f   :  { %v1664_v14 = vpop.eup %1663 }
 0xd40   :  { %758 = vrot.lane.b32.xlu1 %v1664_v14, %s1714_s6 }
 0xdb2   :  { %v759_v15 = vpop.permute.xlu1 %758 }
 0xdb3   :  { %v761_v17 = vsub.f32 %v653_v51, %v759_v15 }
 0xdb5   :  { %763 = vrot.lane.b32.xlu0 %v761_v17, %s1716_s24 }
 0xe27   :  { %v764_v18 = vpop.permute.xlu0 %763 }
 0xe28   :  { %v766_v19 = vmul.f32 %v1662_v9, %v764_v18 }
 0xe2a   :  { %768 = vrot.lane.b32.xlu1 %v766_v19, %s1716_s24 }
 0xe9c   :  { %v769_v20 = vpop.permute.xlu1 %768 }
 0xe9d   :  { %v771_v21 = vadd.f32 %v1664_v14, %v769_v20 }
 0xe9f   :  { %v773_v22 = vrot.slane %v771_v21, 4 }
 0xea1   :  { %774 = vrot.lane.b32.xlu0 %v773_v22, %s1714_s6 }
 0xf13   :  { %v1982_v24 = vpop.permute.xlu0 %774 }
 0xf14   :  { %v781_v8 = vsel %vm239_vm5, %v1982_v24, %v779_v23 }
 0xf15   :  { %v782_v25 = vpack.c.bf16 %v781_v8, %v781_v8  ;;  %v910_v62 = vrot.slane %v781_v8, 4 }
 0xf17   :  { %v784_v26 = vrot.slane %v782_v25, 2 }
 0xf19   :  { %1561 = vmatmul.mubr.msk.bf16.vlgmr.msra.gmra.mxu0 %vm33_vm0, %v784_v26  ;;  %1569 = vmatmul.mubr.msk.bf16.vlgmr.msra.gmra.mxu1 %vm33_vm0, %v784_v26 }
 0xf1a   :  { %1573 = vmatpush3.bf16.msra.mxu0 %v1806_v35  ;;  %1581 = vmatpush3.bf16.msra.mxu1 %v1811_v36 }
 0xf1b   :  { %1574 = vmatprep.subr.bf16.mxu0 %v1711_v16  ;;  %1582 = vmatprep.subr.bf16.mxu1 %v1711_v16 }
 0xf1c   :  { %1576 = vmatprep.mubr.msk.bf16.mxu0 %vm1712_vm1, %v1711_v16  ;;  %1584 = vmatprep.mubr.msk.bf16.mxu1 %vm1712_vm1, %v1711_v16 }
 0xf1e   :  { %1575 = vmatpush3.bf16.msra.mxu0 %v1820_v38  ;;  %1583 = vmatpush3.bf16.msra.mxu1 %v1825_v39 }
 0xf1f   :  { %1588 = vmatprep.subr.bf16.mxu0 %v1711_v16  ;;  %1596 = vmatprep.subr.bf16.mxu1 %v1711_v16 }
 0xfd9   :  { %v822_v27 = vpop.f32.mrf.mxu0  ;;  %v862_v28 = vpop.f32.mrf.mxu1 }
 0xfda   :  { %v868_v29 = vsel %vm252_vm3, %v822_v27, %v862_v28 }
 0xfdb   :  { %v1570_v30 = vpop.f32.mrf.mxu1  ;;  %877 = vrot.lane.b32.xlu1 %v868_v29, %s1714_s6  ;;  %v1562_v31 = vpop.f32.mrf.mxu0  ;;  %v869_v43 = vadd.f32 %v868_v29, %v1856_v0 }
 0xfdd   :  { %v825_v33 = vpop.f32.mrf.mxu0  ;;  %v865_v37 = vpop.f32.mrf.mxu1  ;;  %v1412_v44 = vmul.f32 -1.442695, %v869_v43 }
 0xfdf   :  { %v1563_v40 = vpop.f32.mrf.mxu0  ;;  %v1571_v41 = vpop.f32.mrf.mxu1  ;;  %1665 = vpow2.f32 %v1412_v44 }
 0xfec   :  { %v1666_v45 = vpop.eup %1665 }
 0xfed   :  { %v873_v46 = vadd.f32 1.0, %v1666_v45 }
 0xfef   :  { %1667 = vrcp.f32 %v873_v46 }
 0xffc   :  { %v1668_v47 = vpop.eup %1667 }
0x104d   :  { %v878_v48 = vpop.permute.xlu1 %877 }
0x104e   :  { %v880_v49 = vmul.f32 %v1668_v47, %v878_v48 }
0x1050   :  { %882 = vrot.lane.b32.xlu0 %v880_v49, %s1714_s6 }
0x10c2   :  { %v883_v51 = vpop.permute.xlu0 %882 }
0x10c3   :  { %v885_v52 = vadd.f32 %v883_v51, %v1856_v0  ;;  %v2014_v0 = vld [vmem:[%s2136_s1 + $0x10] sm:$0xff] }
0x10c4   :  { %vm240_vm6 = vcmp.gt.f32.partialorder %v2014_v0, 0.5 }
0x10c5   :  { %1669 = vtanh.f32 %v885_v52 }
0x10d2   :  { %v1670_v53 = vpop.eup %1669 }
0x10d3   :  { %v888_v54 = vrot.slane %v1670_v53, 4 }
0x10d5   :  { %889 = vrot.lane.b32.xlu1 %v888_v54, %s1714_s6 }
0x1147   :  { %v890_v55 = vpop.permute.xlu1 %889 }
0x1148   :  { %v892_v56 = vsub.f32 %v781_v8, %v890_v55 }
0x114a   :  { %v894_v57 = vrot.slane %v892_v56, 4 }
0x114c   :  { %895 = vrot.lane.b32.xlu0 %v894_v57, %s1716_s24 }
0x11be   :  { %v896_v58 = vpop.permute.xlu0 %895 }
0x11bf   :  { %v898_v59 = vmul.f32 %v1668_v47, %v896_v58 }
0x11c1   :  { %900 = vrot.lane.b32.xlu1 %v898_v59, %s1716_s24 }
0x1233   :  { %v901_v60 = vpop.permute.xlu1 %900 }
0x1234   :  { %v903_v61 = vadd.f32 %v1670_v53, %v901_v60 }
0x1236   :  { %905 = vrot.lane.b32.xlu0 %v903_v61, %s1714_s6 }
0x12a8   :  { %v2017_v1 = vpop.permute.xlu0 %905 }
0x12a9   :  { %v912_v5 = vsel %vm240_vm6, %v2017_v1, %v910_v62 }
0x12aa   :  { %v913_v6 = vpack.c.bf16 %v912_v5, %v912_v5  ;;  %v1038_v43 = vrot.slane %v912_v5, 4 }
0x12ac   :  { %1577 = vmatmul.mubr.msk.bf16.vlgmr.msra.gmra.mxu0 %vm33_vm0, %v913_v6  ;;  %1585 = vmatmul.mubr.msk.bf16.vlgmr.msra.gmra.mxu1 %vm33_vm0, %v913_v6 }
0x12ad   :  { %1589 = vmatpush3.bf16.msra.mxu0 %v1806_v35  ;;  %1597 = vmatpush3.bf16.msra.mxu1 %v1811_v36 }
0x12ae   :  { %1590 = vmatprep.subr.bf16.mxu0 %v1711_v16  ;;  %1598 = vmatprep.subr.bf16.mxu1 %v1711_v16 }
0x12af   :  { %1592 = vmatprep.mubr.msk.bf16.mxu0 %vm1712_vm1, %v1711_v16  ;;  %1600 = vmatprep.mubr.msk.bf16.mxu1 %vm1712_vm1, %v1711_v16 }
0x12b1   :  { %1591 = vmatpush3.bf16.msra.mxu0 %v1820_v38  ;;  %1599 = vmatpush3.bf16.msra.mxu1 %v1825_v39 }
0x12b2   :  { %1604 = vmatprep.subr.bf16.mxu0 %v1711_v16  ;;  %1612 = vmatprep.subr.bf16.mxu1 %v1711_v16 }
0x136c   :  { %v951_v9 = vpop.f32.mrf.mxu0  ;;  %v991_v7 = vpop.f32.mrf.mxu1 }
0x136d   :  { %v997_v11 = vsel %vm252_vm3, %v951_v9, %v991_v7 }
0x136e   :  { %v1586_v12 = vpop.f32.mrf.mxu1  ;;  %1006 = vrot.lane.b32.xlu1 %v997_v11, %s1714_s6  ;;  %v1578_v13 = vpop.f32.mrf.mxu0  ;;  %v998_v19 = vadd.f32 %v997_v11, %v1860_v2 }
0x1370   :  { %v954_v14 = vpop.f32.mrf.mxu0  ;;  %v994_v15 = vpop.f32.mrf.mxu1  ;;  %v1415_v20 = vmul.f32 -1.442695, %v998_v19 }
0x1372   :  { %v1579_v17 = vpop.f32.mrf.mxu0  ;;  %v1587_v18 = vpop.f32.mrf.mxu1  ;;  %1671 = vpow2.f32 %v1415_v20 }
0x137f   :  { %v1672_v21 = vpop.eup %1671 }
0x1380   :  { %v1002_v22 = vadd.f32 1.0, %v1672_v21 }
0x1382   :  { %1673 = vrcp.f32 %v1002_v22 }
0x138f   :  { %v1674_v23 = vpop.eup %1673 }
0x13e0   :  { %v1007_v8 = vpop.permute.xlu1 %1006 }
0x13e1   :  { %v1009_v25 = vmul.f32 %v1674_v23, %v1007_v8 }
0x13e3   :  { %1011 = vrot.lane.b32.xlu0 %v1009_v25, %s1714_s6 }
0x1455   :  { %v1012_v26 = vpop.permute.xlu0 %1011 }
0x1456   :  { %v1014_v27 = vadd.f32 %v1012_v26, %v1860_v2 }
0x1458   :  { %1675 = vtanh.f32 %v1014_v27 }
0x1465   :  { %v1676_v28 = vpop.eup %1675 }
0x1466   :  { %1017 = vrot.lane.b32.xlu1 %v1676_v28, %s1714_s6 }
0x14d8   :  { %v1018_v29 = vpop.permute.xlu1 %1017 }
0x14d9   :  { %v1020_v30 = vsub.f32 %v912_v5, %v1018_v29 }
0x14db   :  { %1022 = vrot.lane.b32.xlu0 %v1020_v30, %s1716_s24 }
0x154d   :  { %v1023_v31 = vpop.permute.xlu0 %1022 }
0x154e   :  { %v1025_v33 = vmul.f32 %v1674_v23, %v1023_v31 }
0x1550   :  { %1027 = vrot.lane.b32.xlu1 %v1025_v33, %s1716_s24 }
0x15c2   :  { %v1028_v37 = vpop.permute.xlu1 %1027 }
0x15c3   :  { %v1030_v40 = vadd.f32 %v1676_v28, %v1028_v37 }
0x15c5   :  { %v1032_v41 = vrot.slane %v1030_v40, 4 }
0x15c7   :  { %1033 = vrot.lane.b32.xlu0 %v1032_v41, %s1714_s6 }
0x1639   :  { %v2046_v44 = vpop.permute.xlu0 %1033 }
0x163a   :  { %v1040_v2 = vsel %vm240_vm6, %v2046_v44, %v1038_v43 }
0x163b   :  { %v1041_v45 = vpack.c.bf16 %v1040_v2, %v1040_v2  ;;  %v1169_v14 = vrot.slane %v1040_v2, 4 }
0x163d   :  { %v1043_v46 = vrot.slane %v1041_v45, 2 }
0x163f   :  { %1593 = vmatmul.mubr.msk.bf16.vlgmr.msra.gmra.mxu0 %vm33_vm0, %v1043_v46  ;;  %1601 = vmatmul.mubr.msk.bf16.vlgmr.msra.gmra.mxu1 %vm33_vm0, %v1043_v46 }
0x1640   :  { %1605 = vmatpush3.bf16.msra.mxu0 %v1806_v35  ;;  %1613 = vmatpush3.bf16.msra.mxu1 %v1811_v36 }
0x1641   :  { %1606 = vmatprep.subr.bf16.mxu0 %v1711_v16  ;;  %1614 = vmatprep.subr.bf16.mxu1 %v1711_v16 }
0x1642   :  { %1608 = vmatprep.mubr.msk.bf16.mxu0 %vm1712_vm1, %v1711_v16  ;;  %1616 = vmatprep.mubr.msk.bf16.mxu1 %vm1712_vm1, %v1711_v16 }
0x1644   :  { %1607 = vmatpush3.bf16.msra.mxu0 %v1820_v38  ;;  %1615 = vmatpush3.bf16.msra.mxu1 %v1825_v39 }
0x16ff   :  { %v1081_v47 = vpop.f32.mrf.mxu0  ;;  %v1121_v48 = vpop.f32.mrf.mxu1 }
0x1700   :  { %v1127_v35 = vsel %vm252_vm3, %v1081_v47, %v1121_v48 }
0x1701   :  { %v1602_v36 = vpop.f32.mrf.mxu1  ;;  %1136 = vrot.lane.b32.xlu1 %v1127_v35, %s1714_s6  ;;  %v1594_v49 = vpop.f32.mrf.mxu0  ;;  %v1128_v55 = vadd.f32 %v1127_v35, %v1863_v3 }
0x1702   :  { %v1036_v36 = vsel %vm240_vm6, %v2046_v44, 0.0 }
0x1703   :  { %v1084_v51 = vpop.f32.mrf.mxu0  ;;  %v1124_v52 = vpop.f32.mrf.mxu1  ;;  %v1418_v16 = vmul.f32 -1.442695, %v1128_v55  ;;  %v518_v55 = vsel %vm238_vm4, %v1918_v10, 0.0 }
0x1704   :  { %v1333_v44 = vrot.slane %v518_v55, 6 }
0x1705   :  { %v1595_v53 = vpop.f32.mrf.mxu0  ;;  %v1603_v54 = vpop.f32.mrf.mxu1  ;;  %1677 = vpow2.f32 %v1418_v16  ;;  %v908_v16 = vsel %vm240_vm6, %v2017_v1, 0.0 }
0x1706   :  { %v649_v53 = vsel %vm239_vm5, %v1953_v50, 0.0  ;;  %v1338_v50 = vrot.slane %v1888_v34, 6 }
0x1707   :  { %v1327_v54 = vrot.slane %v649_v53, 6 }
0x1712   :  { %v1678_v38 = vpop.eup %1677 }
0x1713   :  { %v1132_v56 = vadd.f32 1.0, %v1678_v38  ;;  %v1315_v38 = vrot.slane %v908_v16, 6 }
0x1715   :  { %1679 = vrcp.f32 %v1132_v56 }
0x1722   :  { %v1680_v39 = vpop.eup %1679 }
0x1773   :  { %v1137_v57 = vpop.permute.xlu1 %1136 }
0x1774   :  { %v1139_v58 = vmul.f32 %v1680_v39, %v1137_v57 }
0x1776   :  { %1141 = vrot.lane.b32.xlu0 %v1139_v58, %s1714_s6 }
0x17e8   :  { %v1142_v59 = vpop.permute.xlu0 %1141 }
0x17e9   :  { %v1144_v60 = vadd.f32 %v1142_v59, %v1863_v3  ;;  %v237_v3 = vld [vmem:[%s2136_s1 + $0x18] sm:$0xff]  ;;  %s1717_s1 = smov [#allocation2]  }
0x17ea   :  { %vm241_vm7 = vcmp.gt.f32.partialorder %v237_v3, 0.5  ;;  %s1377_s10 = sshll.u32 %s1717_s1, 4  ;;  %s1378_s10 = int_to_ptr.vmem [resolvable:$true] %s1377_s10 }
0x17eb   :  { %1681 = vtanh.f32 %v1144_v60  ;;  %s1689_s11 = scalar_lea.vmem %s1378_s10, 256  ;;  %p1694_p1 = scmp.lt.s32.totalorder %s1378_s10, %s1378_s10 }
0x17ec   :  { %p1690_p0 = scmp.ne.s32.totalorder %s1378_s10, %s1689_s11  ;;  %p1695_p2 = scmp.lt.s32.totalorder %s1689_s11, %s1689_s11 }
0x17ee   :  { %p1696_p3 = por %p1695_p2, %p1694_p1 }
0x17f0   :  { %p1697_p4 = pnand %p1696_p3, %p1690_p0 }
0x17f8   :  { %v1682_v61 = vpop.eup %1681 }
0x17f9   :  { %v1147_v62 = vrot.slane %v1682_v61, 4 }
0x17fb   :  { %1148 = vrot.lane.b32.xlu1 %v1147_v62, %s1714_s6 }
0x186d   :  { %v1149_v5 = vpop.permute.xlu1 %1148 }
0x186e   :  { %v1151_v6 = vsub.f32 %v1040_v2, %v1149_v5 }
0x1870   :  { %v1153_v9 = vrot.slane %v1151_v6, 4 }
0x1872   :  { %1154 = vrot.lane.b32.xlu0 %v1153_v9, %s1716_s24 }
0x18e4   :  { %v1155_v7 = vpop.permute.xlu0 %1154 }
0x18e5   :  { %v1157_v11 = vmul.f32 %v1680_v39, %v1155_v7  ;;  %v777_v39 = vsel %vm239_vm5, %v1982_v24, 0.0 }
0x18e6   :  { %v1321_v0 = vrot.slane %v777_v39, 6 }
0x18e7   :  { %1159 = vrot.lane.b32.xlu1 %v1157_v11, %s1716_s24 }
0x1959   :  { %v1160_v12 = vpop.permute.xlu1 %1159 }
0x195a   :  { %v1162_v13 = vadd.f32 %v1682_v61, %v1160_v12 }
0x195c   :  { %1164 = vrot.lane.b32.xlu0 %v1162_v13, %s1714_s6 }
0x19ce   :  { %v1165_v15 = vpop.permute.xlu0 %1164 }
0x19cf   :  { %v1171_v17 = vsel %vm241_vm7, %v1165_v15, %v1169_v14  ;;  %v1167_v48 = vsel %vm241_vm7, %v1165_v15, 0.0 }
0x19d0   :  { %v1172_v18 = vpack.c.bf16 %v1171_v17, %v1171_v17  ;;  %v1303_v35 = vrot.slane %v1167_v48, 6 }
0x19d2   :  { %1609 = vmatmul.mubr.msk.bf16.vlgmr.msra.gmra.mxu0 %vm33_vm0, %v1172_v18  ;;  %1617 = vmatmul.mubr.msk.bf16.vlgmr.msra.gmra.mxu1 %vm33_vm0, %v1172_v18 }
0x1a92   :  { %v1210_v19 = vpop.f32.mrf.mxu0  ;;  %v1250_v20 = vpop.f32.mrf.mxu1 }
0x1a93   :  { %v1256_v21 = vsel %vm252_vm3, %v1210_v19, %v1250_v20 }
0x1a94   :  { %v1618_v22 = vpop.f32.mrf.mxu1  ;;  %1265 = vrot.lane.b32.xlu1 %v1256_v21, %s1714_s6  ;;  %v1610_v23 = vpop.f32.mrf.mxu0  ;;  %v1257_v28 = vadd.f32 %v1256_v21, %v1866_v4 }
0x1a96   :  { %v1213_v8 = vpop.f32.mrf.mxu0  ;;  %v1253_v25 = vpop.f32.mrf.mxu1  ;;  %v1421_v29 = vmul.f32 -1.442695, %v1257_v28 }
0x1a98   :  { %v1611_v26 = vpop.f32.mrf.mxu0  ;;  %v1619_v27 = vpop.f32.mrf.mxu1  ;;  %1683 = vpow2.f32 %v1421_v29 }
0x1aa5   :  { %v1684_v30 = vpop.eup %1683 }
0x1aa6   :  { %v1261_v31 = vadd.f32 1.0, %v1684_v30 }
0x1aa8   :  { %1685 = vrcp.f32 %v1261_v31 }
0x1ab5   :  { %v1686_v33 = vpop.eup %1685 }
0x1b06   :  { %v1266_v37 = vpop.permute.xlu1 %1265 }
0x1b07   :  { %v1268_v40 = vmul.f32 %v1686_v33, %v1266_v37 }
0x1b09   :  { %1270 = vrot.lane.b32.xlu0 %v1268_v40, %s1714_s6 }
0x1b7b   :  { %v1271_v42 = vpop.permute.xlu0 %1270 }
0x1b7c   :  { %v1273_v41 = vadd.f32 %v1271_v42, %v1866_v4  ;;  %v1309_v4 = vrot.slane %v1036_v36, 6 }
0x1b7e   :  { %1687 = vtanh.f32 %v1273_v41 }
0x1b8b   :  { %v1688_v43 = vpop.eup %1687 }
0x1b8c   :  { %1276 = vrot.lane.b32.xlu1 %v1688_v43, %s1714_s6 }
0x1bfe   :  { %v1277_v2 = vpop.permute.xlu1 %1276 }
0x1bff   :  { %v1279_v45 = vsub.f32 %v1171_v17, %v1277_v2 }
0x1c01   :  { %1281 = vrot.lane.b32.xlu0 %v1279_v45, %s1716_s24 }
0x1c73   :  { %v1282_v46 = vpop.permute.xlu0 %1281 }
0x1c74   :  { %v1284_v47 = vmul.f32 %v1686_v33, %v1282_v46 }
0x1c76   :  { %1286 = vrot.lane.b32.xlu1 %v1284_v47, %s1716_s24 }
0x1c7a   :  { %1304 = vrot.lane.b32.xlu1 %v1303_v35, %s1716_s24 }
0x1c7e   :  { %1310 = vrot.lane.b32.xlu1 %v1309_v4, %s1716_s24 }
0x1ce8   :  { %v1287_v49 = vpop.permute.xlu1 %1286 }
0x1ce9   :  { %v1289_v51 = vadd.f32 %v1688_v43, %v1287_v49 }
0x1ceb   :  { %v1291_v52 = vrot.slane %v1289_v51, 4 }
0x1cec   :  { %v1305_v58 = vpop.permute.xlu1 %1304 }
0x1ced   :  { %1292 = vrot.lane.b32.xlu0 %v1291_v52, %s1714_s6  ;;  %v1307_v61 = vsel %vm33_vm0, %v518_v55, %v1305_v58 }
0x1cee   :  { %v1344_v6 = vrot.slane %v1307_v61, 2 }
0x1cf0   :  { %v1311_v60 = vpop.permute.xlu1 %1310 }
0x1cf1   :  { %1328 = vrot.lane.b32.xlu0 %v1327_v54, %s1716_s24  ;;  %v1313_v62 = vsel %vm33_vm0, %v649_v53, %v1311_v60 }
0x1cf2   :  { %v1347_v24 = vrot.slane %v1313_v62, 4 }
0x1cf5   :  { %1334 = vrot.lane.b32.xlu0 %v1333_v44, %s1716_s24 }
0x1cf9   :  { %1316 = vrot.lane.b32.xlu0 %v1315_v38, %s1716_s24 }
0x1cfd   :  { %1339 = vrot.lane.b32.xlu0 %v1338_v50, %s1716_s24 }
0x1d5f   :  { %v1293_v56 = vpop.permute.xlu0 %1292 }
0x1d60   :  { %v1295_v32 = vsel %vm241_vm7, %v1293_v56, 0.0 }
0x1d61   :  { %v1297_v10 = vrot.slane %v1295_v32, 6 }
0x1d63   :  { %1298 = vrot.lane.b32.xlu1 %v1297_v10, %s1716_s24  ;;  %v1329_v1 = vpop.permute.xlu0 %1328 }
0x1d64   :  { %v1331_v7 = vsel %vm33_vm0, %v1036_v36, %v1329_v1 }
0x1d65   :  { %v1353_v17 = vrot.slane %v1331_v7, 2 }
0x1d67   :  { %1322 = vrot.lane.b32.xlu1 %v1321_v0, %s1716_s24  ;;  %v1335_v57 = vpop.permute.xlu0 %1334 }
0x1d68   :  { %v1337_v12 = vsel %vm33_vm0, %v1167_v48, %v1335_v57 }
0x1d69   :  { %v1356_v20 = vrot.slane %v1337_v12, 4 }
0x1d6b   :  { %v1317_v59 = vpop.permute.xlu0 %1316 }
0x1d6c   :  { %v1319_v5 = vsel %vm33_vm0, %v777_v39, %v1317_v59 }
0x1d6d   :  { %v1350_v13 = vrot.slane %v1319_v5, 6 }
0x1d6f   :  { %v1340_v9 = vpop.permute.xlu0 %1339 }
0x1d70   :  { %v1342_v14 = vsel %vm33_vm0, %v1295_v32, %v1340_v9 }
0x1dd5   :  { %v1299_v63 = vpop.permute.xlu1 %1298 }
0x1dd6   :  { %v1301_v11 = vsel %vm33_vm0, %v1888_v34, %v1299_v63  ;;  %v1359_v34 = vrot.slane %v1342_v14, 6 }
0x1dd7   :  { %v1361_v3 = vsel %vm200_vm2, %v1301_v11, %v1344_v6 }
0x1dd8   :  { %v1363_v15 = vsel %vm1362_vm8, %v1361_v3, %v1347_v24 }
0x1dd9   :  { %v1365_v18 = vsel %vm1364_vm9, %v1363_v15, %v1350_v13  ;;  %v1323_v19 = vpop.permute.xlu1 %1322 }
0x1dda   :  { %v1325_v21 = vsel %vm33_vm0, %v908_v16, %v1323_v19  ;;  %1370 = vst.msk [vmem:[#allocation2] sm:$0xff] %vm1369_vm10, %v1365_v18 }
0x1ddb   :  { %v1366_v22 = vsel %vm200_vm2, %v1325_v21, %v1353_v17 }
0x1ddc   :  { %v1367_v23 = vsel %vm1362_vm8, %v1366_v22, %v1356_v20 }
0x1ddd   :  { %v1368_v8 = vsel %vm1364_vm9, %v1367_v23, %v1359_v34 }
0x1dde   :  { %1371 = vst.msk [vmem:[#allocation2 + $0x8] sm:$0xff] %vm1369_vm10, %v1368_v8 }
0x1ddf   :  { %1700 = shalt.err (!%p1697_p4)
}
0x1de0   :  { %s1718_s12 = smov 128   ;;  %s1719_s13 = smov 8  }
0x1de1   :  { %1383 = dma.vmem_to_hbm [thread:$0]  %s1378_s10, 256, %s2143_s8, [#allocation3], %s1718_s12, %s1718_s12, %s1719_s13  }
0x1de2   :  { %1709 = dma.done.wait [#allocation3], 256  }
0x1de3   :  { %1710 = vsyncadd [#allocation3], 4294967040 }
0x1de4   :  { %1387 = vsyncpa [#allocation3], 1 }

</bundles_post_ra>
